<compile_context>
chip_gen: v7x
topology: tpu7x:2x2x1
jax: 0.10.0
libtpu: 0.0.40
codegen_flags: <defaults>
</compile_context>

<pallas_src>
import functools

import jax
import jax.numpy as jnp
from jax.experimental import pallas as pl
from jax.experimental.pallas import tpu as pltpu


def _round_up(x, m):
    return ((x + m - 1) // m) * m


def _choose_tm(m):
    """Row-tile size: multiple of 16 (bf16 packs (16,128) per vreg), and keep
    >= 4 grid steps when possible so v7x's two TensorCores each get >= 2
    'parallel' steps."""
    for tm in (512, 256, 128, 64, 32, 16):
        if m >= 4 * tm:
            return tm
    return 16


# ---------------------------------------------------------------------------
# Fused 3-stage kernel: matmul+ReLU, matmul+ReLU, 4x per-tap matmul+ReLU.
# ---------------------------------------------------------------------------
def _linknet_up_fused_kernel(x_ref, w1_ref, b1_ref, w2_ref, b2_ref,
                             w3_ref, b3_ref, o_ref, *, c2p, coutp):
    # Stage 1: 1x1 conv (Cin -> C2p) + folded BN + ReLU
    y1 = jnp.dot(x_ref[...], w1_ref[...], preferred_element_type=jnp.float32)
    y1 = jnp.maximum(y1 + b1_ref[...], 0.0)

    # Stage 2: 2x2 stride-2 transposed conv -> (tm, 4*C2p), tap-major, +BN+ReLU
    y2 = jnp.dot(y1.astype(w2_ref.dtype), w2_ref[...],
                 preferred_element_type=jnp.float32)
    y2 = jnp.maximum(y2 + b2_ref[...], 0.0).astype(w3_ref.dtype)

    # Stage 3: per-tap 1x1 conv (C2p -> Coutp) with a SHARED weight matrix.
    # Four unrolled dots replace the old block-diagonal (4*C2p,4*Coutp) matmul:
    # no structural-zero FLOPs, 16x smaller weight block.  c2p/coutp are
    # multiples of 128 so every slice is lane-aligned (unmasked loads/stores).
    for t in range(4):
        y3 = jnp.dot(y2[:, t * c2p:(t + 1) * c2p], w3_ref[...],
                     preferred_element_type=jnp.float32)
        y3 = jnp.maximum(y3 + b3_ref[...], 0.0)
        o_ref[:, t * coutp:(t + 1) * coutp] = y3.astype(o_ref.dtype)


def fused_linknet_up_mm(x2d, w1, b1, w2, b2, w3, b3, out_dtype=jnp.bfloat16):
    """x2d: (M, Cin). Returns (M, 4*Coutp) `out_dtype`, tap-major columns."""
    m, cin = x2d.shape
    c2p = w1.shape[1]           # multiple of 128
    coutp = w3.shape[1]         # multiple of 128
    n3 = 4 * coutp

    tm = _choose_tm(m)
    mp = _round_up(m, tm)
    if mp != m:
        x2d = jnp.pad(x2d, ((0, mp - m), (0, 0)))
    grid = (mp // tm,)

    wsize = x2d.dtype.itemsize
    osize = jnp.dtype(out_dtype).itemsize
    flops = int(2 * mp * (cin * c2p + c2p * 4 * c2p + 4 * c2p * coutp))
    bytes_accessed = int(
        mp * cin * wsize
        + (w1.size + w2.size + w3.size) * wsize
        + (b1.size + b2.size + b3.size) * 4
        + mp * n3 * osize)

    kernel = functools.partial(_linknet_up_fused_kernel, c2p=c2p, coutp=coutp)

    out = pl.pallas_call(
        kernel,
        out_shape=jax.ShapeDtypeStruct((mp, n3), out_dtype),
        grid_spec=pltpu.PrefetchScalarGridSpec(
            num_scalar_prefetch=0,
            grid=grid,
            in_specs=[
                pl.BlockSpec((tm, cin), lambda i: (i, 0)),
                pl.BlockSpec((cin, c2p), lambda i: (0, 0)),
                pl.BlockSpec((1, c2p), lambda i: (0, 0)),
                pl.BlockSpec((c2p, 4 * c2p), lambda i: (0, 0)),
                pl.BlockSpec((1, 4 * c2p), lambda i: (0, 0)),
                pl.BlockSpec((c2p, coutp), lambda i: (0, 0)),
                pl.BlockSpec((1, coutp), lambda i: (0, 0)),
            ],
            out_specs=pl.BlockSpec((tm, n3), lambda i: (i, 0)),
        ),
        compiler_params=pltpu.CompilerParams(
            dimension_semantics=("parallel",),
            # Conservative so it stays under v7x's 64 MiB VMEM; ample for the
            # double-buffered x/out tiles plus the (now small) shared weights.
            vmem_limit_bytes=32 * 1024 * 1024,
        ),
        cost_estimate=pl.CostEstimate(
            flops=flops, transcendentals=0, bytes_accessed=bytes_accessed),
    )(x2d, w1, b1, w2, b2, w3, b3)

    return out[:m] if mp != m else out


# ---------------------------------------------------------------------------
# BN folding (eval-mode BatchNorm: running_mean / running_var)
# ---------------------------------------------------------------------------
def fold_bn(conv_bias, gamma, beta, running_mean, running_var, eps=1e-5):
    s = gamma / jnp.sqrt(running_var + eps)        # per-channel scale
    sh = (conv_bias - running_mean) * s + beta     # per-channel shift
    return s, sh


def _prep_operands(params, compute_dtype=jnp.bfloat16):
    """Fold BN into weights/shifts, pad C2 and Cout to multiples of 128
    (zero weights/bias on padded channels -> exactly zero, sliced off later),
    cast weights to bf16."""
    p1, p2, p3 = params["conv1"], params["deconv2"], params["conv3"]
    cin, c2 = p1["w"].shape
    cout = p3["w"].shape[1]
    c2p = _round_up(c2, 128)
    coutp = _round_up(cout, 128)

    # stage 1: (Cin, C2) -> (Cin, C2p)
    s1, sh1 = fold_bn(p1["b"], p1["gamma"], p1["beta"], p1["mean"], p1["var"])
    w1 = jnp.zeros((cin, c2p), jnp.float32).at[:, :c2].set(p1["w"] * s1[None, :])
    b1 = jnp.zeros((1, c2p), jnp.float32).at[0, :c2].set(sh1)

    # stage 2: tap-major columns, col = t*C2p + co with t = dh*2 + dw
    s2, sh2 = fold_bn(p2["b"], p2["gamma"], p2["beta"], p2["mean"], p2["var"])
    w2_3d = p2["w2d"].reshape(c2, 4, c2) * s2[None, None, :]     # [ci, t, co]
    w2 = jnp.zeros((c2p, 4, c2p), jnp.float32).at[:c2, :, :c2].set(w2_3d)
    w2 = w2.reshape(c2p, 4 * c2p)
    b2 = jnp.zeros((4, c2p), jnp.float32).at[:, :c2].set(
        jnp.broadcast_to(sh2, (4, c2)))
    b2 = b2.reshape(1, 4 * c2p)

    # stage 3: single shared (C2p, Coutp) weight, applied per tap in-kernel
    s3, sh3 = fold_bn(p3["b"], p3["gamma"], p3["beta"], p3["mean"], p3["var"])
    w3 = jnp.zeros((c2p, coutp), jnp.float32).at[:c2, :cout].set(
        p3["w"] * s3[None, :])
    b3 = jnp.zeros((1, coutp), jnp.float32).at[0, :cout].set(sh3)

    return (w1.astype(compute_dtype), b1,
            w2.astype(compute_dtype), b2,
            w3.astype(compute_dtype), b3,
            cout, coutp)


# ---------------------------------------------------------------------------
# linknetUp forward
# ---------------------------------------------------------------------------
def linknet_up_forward(x_nchw, params, compute_dtype=jnp.bfloat16):
    """x_nchw: (N, Cin, H, W) float32.  Returns (N, n_filters, 2H, 2W) f32."""
    n, cin, h, w = x_nchw.shape
    w1, b1, w2, b2, w3, b3, cout, coutp = _prep_operands(params, compute_dtype)

    x2d = jnp.transpose(x_nchw, (0, 2, 3, 1)).reshape(n * h * w, cin)
    x2d = x2d.astype(compute_dtype)

    y = fused_linknet_up_mm(x2d, w1, b1, w2, b2, w3, b3)   # (N*H*W, 4*Coutp) bf16

    # Pixel-shuffle + NHWC->NCHW in ONE bf16 transpose:
    # y[n,h,w,dh,dw,c] -> out[n,c,2h+dh,2w+dw]; un-pad channels, then cast.
    y = y.reshape(n, h, w, 2, 2, coutp)
    y = jnp.transpose(y, (0, 5, 1, 3, 2, 4)).reshape(n, coutp, 2 * h, 2 * w)
    return y[:, :cout].astype(jnp.float32)


# ---------------------------------------------------------------------------
# Deterministic parameter construction (PyTorch-equivalent layouts)
# ---------------------------------------------------------------------------
def make_params(key, in_channels, n_filters):
    c_half = int(n_filters / 2)
    c_out = int(n_filters)
    ks = jax.random.split(key, 16)

    def bn(k, c):
        k1, k2, k3, k4 = jax.random.split(k, 4)
        return dict(
            gamma=1.0 + 0.1 * jax.random.normal(k1, (c,), jnp.float32),
            beta=0.1 * jax.random.normal(k2, (c,), jnp.float32),
            mean=0.05 * jax.random.normal(k3, (c,), jnp.float32),
            var=jnp.abs(1.0 + 0.1 * jax.random.normal(k4, (c,), jnp.float32)),
        )

    # stage 1: 1x1 conv weights as (Cin, C2) matmul matrix
    conv1 = dict(
        w=0.2 * jax.random.normal(ks[0], (in_channels, c_half), jnp.float32),
        b=0.05 * jax.random.normal(ks[1], (c_half,), jnp.float32),
        **bn(ks[2], c_half),
    )

    # stage 2: transposed conv weight, PyTorch layout (Cin, Cout, kH, kW)
    wt = 0.2 * jax.random.normal(ks[3], (c_half, c_half, 2, 2), jnp.float32)
    # -> (Cin, kH, kW, Cout) -> (Cin, 4*Cout): column = (dh*2+dw)*Cout + co
    w2d = jnp.transpose(wt, (0, 2, 3, 1)).reshape(c_half, 4 * c_half)
    deconv2 = dict(
        w2d=w2d,
        b=0.05 * jax.random.normal(ks[4], (c_half,), jnp.float32),
        **bn(ks[5], c_half),
    )

    # stage 3: 1x1 conv (C2 -> Cout)
    conv3 = dict(
        w=0.2 * jax.random.normal(ks[6], (c_half, c_out), jnp.float32),
        b=0.05 * jax.random.normal(ks[7], (c_out,), jnp.float32),
        **bn(ks[8], c_out),
    )
    return dict(conv1=conv1, deconv2=deconv2, conv3=conv3)


# ---------------------------------------------------------------------------
# Pure-JAX f32 reference (sanity check of the fused kernel)
# ---------------------------------------------------------------------------
def reference_forward(x_nchw, params):
    n, cin, h, w = x_nchw.shape
    x = jnp.transpose(x_nchw, (0, 2, 3, 1))

    def cbr(x2d, wm, b, g, be, m, v):
        y = x2d @ wm + b
        y = (y - m) / jnp.sqrt(v + 1e-5) * g + be
        return jnp.maximum(y, 0.0)

    p = params["conv1"]
    c2 = p["w"].shape[1]
    y1 = cbr(x.reshape(-1, cin), p["w"], p["b"], p["gamma"], p["beta"],
             p["mean"], p["var"])
    p = params["deconv2"]
    y2 = y1 @ p["w2d"] + jnp.tile(p["b"], 4)
    y2 = y2.reshape(n, h, w, 2, 2, c2)
    y2 = jnp.transpose(y2, (0, 1, 3, 2, 4, 5)).reshape(n, 2 * h, 2 * w, c2)
    y2 = (y2 - p["mean"]) / jnp.sqrt(p["var"] + 1e-5) * p["gamma"] + p["beta"]
    y2 = jnp.maximum(y2, 0.0)
    p = params["conv3"]
    y3 = cbr(y2.reshape(-1, c2), p["w"], p["b"], p["gamma"], p["beta"],
             p["mean"], p["var"])
    out = y3.reshape(n, 2 * h, 2 * w, p["w"].shape[1])
    return jnp.transpose(out, (0, 3, 1, 2))


if __name__ == "__main__":
    key = jax.random.PRNGKey(0)
    k_x, k_p = jax.random.split(key)

    batch, in_channels, n_filters, spatial = 2, 16, 8, 16
    x = jax.random.normal(k_x, (batch, in_channels, spatial, spatial),
                          jnp.float32)                       # NCHW input
    params = make_params(k_p, in_channels, n_filters)

    fwd = jax.jit(functools.partial(linknet_up_forward))
    out = jax.block_until_ready(fwd(x, params))

    ref = reference_forward(x, params)
    assert out.shape == (batch, n_filters, 2 * spatial, 2 * spatial), out.shape
    # bf16 operands/output with f32 accumulation vs. the pure-f32 reference.
    max_err = float(jnp.max(jnp.abs(out - ref)))
    assert jnp.allclose(out, ref, atol=5e-2, rtol=5e-2), (
        f"mismatch vs reference, max abs err {max_err}")

    print("KERNEL_OK")
</pallas_src>

<mosaic_0001>
module attributes {stable_mosaic.version = 11 : i64} {
  func.func @_linknet_up_fused_kernel(%arg0: i32, %arg1: memref<128x16xbf16, #tpu.memory_space<vmem>>, %arg2: memref<16x128xbf16, #tpu.memory_space<vmem>>, %arg3: memref<1x128xf32, #tpu.memory_space<vmem>>, %arg4: memref<128x512xbf16, #tpu.memory_space<vmem>>, %arg5: memref<1x512xf32, #tpu.memory_space<vmem>>, %arg6: memref<128x128xbf16, #tpu.memory_space<vmem>>, %arg7: memref<1x128xf32, #tpu.memory_space<vmem>>, %arg8: memref<128x512xbf16, #tpu.memory_space<vmem>>) attributes {dimension_semantics = [#tpu.dimension_semantics<parallel>], iteration_bounds = array<i64: 4>, scalar_prefetch = 0 : i64, scratch_operands = 0 : i64, tpu.core_type = #tpu.core_type<tc>, window_params = [{transform_indices = @transform_0, window_bounds = array<i64: 128, 16>}, {pipeline_mode = #tpu.pipeline_mode<synchronous>, transform_indices = @transform_1, window_bounds = array<i64: 16, 128>}, {pipeline_mode = #tpu.pipeline_mode<synchronous>, transform_indices = @transform_2, window_bounds = array<i64: 1, 128>}, {pipeline_mode = #tpu.pipeline_mode<synchronous>, transform_indices = @transform_3, window_bounds = array<i64: 128, 512>}, {pipeline_mode = #tpu.pipeline_mode<synchronous>, transform_indices = @transform_4, window_bounds = array<i64: 1, 512>}, {pipeline_mode = #tpu.pipeline_mode<synchronous>, transform_indices = @transform_5, window_bounds = array<i64: 128, 128>}, {pipeline_mode = #tpu.pipeline_mode<synchronous>, transform_indices = @transform_6, window_bounds = array<i64: 1, 128>}, {transform_indices = @transform_7, window_bounds = array<i64: 128, 512>}]} {
    %c0 = arith.constant 0 : index
    %c0_0 = arith.constant 0 : index
    %0 = vector.load %arg1[%c0, %c0_0] : memref<128x16xbf16, #tpu.memory_space<vmem>>, vector<128x16xbf16>
    %c0_1 = arith.constant 0 : index
    %c0_2 = arith.constant 0 : index
    %1 = vector.load %arg2[%c0_1, %c0_2] : memref<16x128xbf16, #tpu.memory_space<vmem>>, vector<16x128xbf16>
    %cst = arith.constant dense<0.000000e+00> : vector<128x128xf32>
    %2 = tpu.matmul %0, %1, %cst {dimension_numbers = #tpu.dot_dimension_numbers<[1], [0], [0], [1], [0, 0, 1, 1], [], []>} : vector<128x16xbf16>, vector<16x128xbf16>, vector<128x128xf32> -> vector<128x128xf32>
    %c0_3 = arith.constant 0 : index
    %c0_4 = arith.constant 0 : index
    %3 = vector.load %arg3[%c0_3, %c0_4] : memref<1x128xf32, #tpu.memory_space<vmem>>, vector<1x128xf32>
    %4 = vector.broadcast %3 : vector<1x128xf32> to vector<128x128xf32>
    %5 = arith.addf %2, %4 : vector<128x128xf32>
    %cst_5 = arith.constant 0.000000e+00 : f32
    %6 = vector.broadcast %cst_5 : f32 to vector<128x128xf32>
    %7 = arith.maximumf %5, %6 : vector<128x128xf32>
    %8 = arith.truncf %7 : vector<128x128xf32> to vector<128x128xbf16>
    %c0_6 = arith.constant 0 : index
    %c0_7 = arith.constant 0 : index
    %9 = vector.load %arg4[%c0_6, %c0_7] : memref<128x512xbf16, #tpu.memory_space<vmem>>, vector<128x512xbf16>
    %cst_8 = arith.constant dense<0.000000e+00> : vector<128x512xf32>
    %10 = tpu.matmul %8, %9, %cst_8 {dimension_numbers = #tpu.dot_dimension_numbers<[1], [0], [0], [1], [0, 0, 1, 1], [], []>} : vector<128x128xbf16>, vector<128x512xbf16>, vector<128x512xf32> -> vector<128x512xf32>
    %c0_9 = arith.constant 0 : index
    %c0_10 = arith.constant 0 : index
    %11 = vector.load %arg5[%c0_9, %c0_10] : memref<1x512xf32, #tpu.memory_space<vmem>>, vector<1x512xf32>
    %12 = vector.broadcast %11 : vector<1x512xf32> to vector<128x512xf32>
    %13 = arith.addf %10, %12 : vector<128x512xf32>
    %cst_11 = arith.constant 0.000000e+00 : f32
    %14 = vector.broadcast %cst_11 : f32 to vector<128x512xf32>
    %15 = arith.maximumf %13, %14 : vector<128x512xf32>
    %16 = arith.truncf %15 : vector<128x512xf32> to vector<128x512xbf16>
    %17 = vector.extract_strided_slice %16 {offsets = [0, 0], sizes = [128, 128], strides = [1, 1]} : vector<128x512xbf16> to vector<128x128xbf16>
    %c0_12 = arith.constant 0 : index
    %c0_13 = arith.constant 0 : index
    %18 = vector.load %arg6[%c0_12, %c0_13] : memref<128x128xbf16, #tpu.memory_space<vmem>>, vector<128x128xbf16>
    %cst_14 = arith.constant dense<0.000000e+00> : vector<128x128xf32>
    %19 = tpu.matmul %17, %18, %cst_14 {dimension_numbers = #tpu.dot_dimension_numbers<[1], [0], [0], [1], [0, 0, 1, 1], [], []>} : vector<128x128xbf16>, vector<128x128xbf16>, vector<128x128xf32> -> vector<128x128xf32>
    %c0_15 = arith.constant 0 : index
    %c0_16 = arith.constant 0 : index
    %20 = vector.load %arg7[%c0_15, %c0_16] : memref<1x128xf32, #tpu.memory_space<vmem>>, vector<1x128xf32>
    %21 = vector.broadcast %20 : vector<1x128xf32> to vector<128x128xf32>
    %22 = arith.addf %19, %21 : vector<128x128xf32>
    %cst_17 = arith.constant 0.000000e+00 : f32
    %23 = vector.broadcast %cst_17 : f32 to vector<128x128xf32>
    %24 = arith.maximumf %22, %23 : vector<128x128xf32>
    %25 = arith.truncf %24 : vector<128x128xf32> to vector<128x128xbf16>
    %c0_18 = arith.constant 0 : index
    %c0_19 = arith.constant 0 : index
    %26 = vector.load %arg8[%c0_18, %c0_19] : memref<128x512xbf16, #tpu.memory_space<vmem>>, vector<128x128xbf16>
    tpu.vector_store %arg8[%c0_18, %c0_19], %25 {strides = array<i32>} : memref<128x512xbf16, #tpu.memory_space<vmem>>, vector<128x128xbf16>,
    %27 = vector.extract_strided_slice %16 {offsets = [0, 128], sizes = [128, 128], strides = [1, 1]} : vector<128x512xbf16> to vector<128x128xbf16>
    %c0_20 = arith.constant 0 : index
    %c0_21 = arith.constant 0 : index
    %28 = vector.load %arg6[%c0_20, %c0_21] : memref<128x128xbf16, #tpu.memory_space<vmem>>, vector<128x128xbf16>
    %cst_22 = arith.constant dense<0.000000e+00> : vector<128x128xf32>
    %29 = tpu.matmul %27, %28, %cst_22 {dimension_numbers = #tpu.dot_dimension_numbers<[1], [0], [0], [1], [0, 0, 1, 1], [], []>} : vector<128x128xbf16>, vector<128x128xbf16>, vector<128x128xf32> -> vector<128x128xf32>
    %c0_23 = arith.constant 0 : index
    %c0_24 = arith.constant 0 : index
    %30 = vector.load %arg7[%c0_23, %c0_24] : memref<1x128xf32, #tpu.memory_space<vmem>>, vector<1x128xf32>
    %31 = vector.broadcast %30 : vector<1x128xf32> to vector<128x128xf32>
    %32 = arith.addf %29, %31 : vector<128x128xf32>
    %cst_25 = arith.constant 0.000000e+00 : f32
    %33 = vector.broadcast %cst_25 : f32 to vector<128x128xf32>
    %34 = arith.maximumf %32, %33 : vector<128x128xf32>
    %35 = arith.truncf %34 : vector<128x128xf32> to vector<128x128xbf16>
    %c0_26 = arith.constant 0 : index
    %c128 = arith.constant 128 : index
    %36 = vector.load %arg8[%c0_26, %c128] : memref<128x512xbf16, #tpu.memory_space<vmem>>, vector<128x128xbf16>
    tpu.vector_store %arg8[%c0_26, %c128], %35 {strides = array<i32>} : memref<128x512xbf16, #tpu.memory_space<vmem>>, vector<128x128xbf16>,
    %37 = vector.extract_strided_slice %16 {offsets = [0, 256], sizes = [128, 128], strides = [1, 1]} : vector<128x512xbf16> to vector<128x128xbf16>
    %c0_27 = arith.constant 0 : index
    %c0_28 = arith.constant 0 : index
    %38 = vector.load %arg6[%c0_27, %c0_28] : memref<128x128xbf16, #tpu.memory_space<vmem>>, vector<128x128xbf16>
    %cst_29 = arith.constant dense<0.000000e+00> : vector<128x128xf32>
    %39 = tpu.matmul %37, %38, %cst_29 {dimension_numbers = #tpu.dot_dimension_numbers<[1], [0], [0], [1], [0, 0, 1, 1], [], []>} : vector<128x128xbf16>, vector<128x128xbf16>, vector<128x128xf32> -> vector<128x128xf32>
    %c0_30 = arith.constant 0 : index
    %c0_31 = arith.constant 0 : index
    %40 = vector.load %arg7[%c0_30, %c0_31] : memref<1x128xf32, #tpu.memory_space<vmem>>, vector<1x128xf32>
    %41 = vector.broadcast %40 : vector<1x128xf32> to vector<128x128xf32>
    %42 = arith.addf %39, %41 : vector<128x128xf32>
    %cst_32 = arith.constant 0.000000e+00 : f32
    %43 = vector.broadcast %cst_32 : f32 to vector<128x128xf32>
    %44 = arith.maximumf %42, %43 : vector<128x128xf32>
    %45 = arith.truncf %44 : vector<128x128xf32> to vector<128x128xbf16>
    %c0_33 = arith.constant 0 : index
    %c256 = arith.constant 256 : index
    %46 = vector.load %arg8[%c0_33, %c256] : memref<128x512xbf16, #tpu.memory_space<vmem>>, vector<128x128xbf16>
    tpu.vector_store %arg8[%c0_33, %c256], %45 {strides = array<i32>} : memref<128x512xbf16, #tpu.memory_space<vmem>>, vector<128x128xbf16>,
    %47 = vector.extract_strided_slice %16 {offsets = [0, 384], sizes = [128, 128], strides = [1, 1]} : vector<128x512xbf16> to vector<128x128xbf16>
    %c0_34 = arith.constant 0 : index
    %c0_35 = arith.constant 0 : index
    %48 = vector.load %arg6[%c0_34, %c0_35] : memref<128x128xbf16, #tpu.memory_space<vmem>>, vector<128x128xbf16>
    %cst_36 = arith.constant dense<0.000000e+00> : vector<128x128xf32>
    %49 = tpu.matmul %47, %48, %cst_36 {dimension_numbers = #tpu.dot_dimension_numbers<[1], [0], [0], [1], [0, 0, 1, 1], [], []>} : vector<128x128xbf16>, vector<128x128xbf16>, vector<128x128xf32> -> vector<128x128xf32>
    %c0_37 = arith.constant 0 : index
    %c0_38 = arith.constant 0 : index
    %50 = vector.load %arg7[%c0_37, %c0_38] : memref<1x128xf32, #tpu.memory_space<vmem>>, vector<1x128xf32>
    %51 = vector.broadcast %50 : vector<1x128xf32> to vector<128x128xf32>
    %52 = arith.addf %49, %51 : vector<128x128xf32>
    %cst_39 = arith.constant 0.000000e+00 : f32
    %53 = vector.broadcast %cst_39 : f32 to vector<128x128xf32>
    %54 = arith.maximumf %52, %53 : vector<128x128xf32>
    %55 = arith.truncf %54 : vector<128x128xf32> to vector<128x128xbf16>
    %c0_40 = arith.constant 0 : index
    %c384 = arith.constant 384 : index
    %56 = vector.load %arg8[%c0_40, %c384] : memref<128x512xbf16, #tpu.memory_space<vmem>>, vector<128x128xbf16>
    tpu.vector_store %arg8[%c0_40, %c384], %55 {strides = array<i32>} : memref<128x512xbf16, #tpu.memory_space<vmem>>, vector<128x128xbf16>,
    return
  }
  func.func @transform_0(%arg0: i32) -> (i32, i32) {
    %c0_i32 = arith.constant 0 : i32
    %c0_i32_0 = arith.constant 0 : i32
    return %arg0, %c0_i32 : i32, i32
  }
  func.func @transform_1(%arg0: i32) -> (i32, i32) {
    %c0_i32 = arith.constant 0 : i32
    %c0_i32_0 = arith.constant 0 : i32
    %c0_i32_1 = arith.constant 0 : i32
    return %c0_i32, %c0_i32_0 : i32, i32
  }
  func.func @transform_2(%arg0: i32) -> (i32, i32) {
    %c0_i32 = arith.constant 0 : i32
    %c0_i32_0 = arith.constant 0 : i32
    %c0_i32_1 = arith.constant 0 : i32
    return %c0_i32, %c0_i32_0 : i32, i32
  }
  func.func @transform_3(%arg0: i32) -> (i32, i32) {
    %c0_i32 = arith.constant 0 : i32
    %c0_i32_0 = arith.constant 0 : i32
    %c0_i32_1 = arith.constant 0 : i32
    return %c0_i32, %c0_i32_0 : i32, i32
  }
  func.func @transform_4(%arg0: i32) -> (i32, i32) {
    %c0_i32 = arith.constant 0 : i32
    %c0_i32_0 = arith.constant 0 : i32
    %c0_i32_1 = arith.constant 0 : i32
    return %c0_i32, %c0_i32_0 : i32, i32
  }
  func.func @transform_5(%arg0: i32) -> (i32, i32) {
    %c0_i32 = arith.constant 0 : i32
    %c0_i32_0 = arith.constant 0 : i32
    %c0_i32_1 = arith.constant 0 : i32
    return %c0_i32, %c0_i32_0 : i32, i32
  }
  func.func @transform_6(%arg0: i32) -> (i32, i32) {
    %c0_i32 = arith.constant 0 : i32
    %c0_i32_0 = arith.constant 0 : i32
    %c0_i32_1 = arith.constant 0 : i32
    return %c0_i32, %c0_i32_0 : i32, i32
  }
  func.func @transform_7(%arg0: i32) -> (i32, i32) {
    %c0_i32 = arith.constant 0 : i32
    %c0_i32_0 = arith.constant 0 : i32
    return %arg0, %c0_i32 : i32, i32
  }
}

</mosaic_0001>

<bundles_post_ra>
// kernel: linknet_up_forward.1
= control target key start
LH: loop header
LB: loop body
LE: loop exit
PB: predicated region body
PF: predicated region fallthrough
CT: control target
= control target key end

     0   :  { %s2745_s24 = smov 0   ;;  %s3270_s0 = inlined_call_operand.vmem [shape: bf16[512,16], index: 0, kind: input, shape index: {}]   ;;  %s3271_s1 = inlined_call_operand.vmem [shape: bf16[16,128], index: 1, kind: input, shape index: {}]   ;;  %s3272_s2 = inlined_call_operand.vmem [shape: f32[1,128], index: 2, kind: input, shape index: {}]   ;;  %s3273_s3 = inlined_call_operand.vmem [shape: bf16[128,512], index: 3, kind: input, shape index: {}]   ;;  %s3274_s4 = inlined_call_operand.vmem [shape: f32[1,512], index: 4, kind: input, shape index: {}]   ;;  %s3275_s5 = inlined_call_operand.vmem [shape: bf16[128,128], index: 5, kind: input, shape index: {}]   ;;  %s3276_s6 = inlined_call_operand.vmem [shape: f32[1,128], index: 6, kind: input, shape index: {}]   ;;  %s3277_s7 = inlined_call_operand.vmem [shape: bf16[512,512], index: 7, kind: output, shape index: {}]  }
   0x1 LB: > { %s2152_s25 = sadd.s32 4294967295, %s2702_s24   ;;  %p2156_p0 = scmp.ge.s32.totalorder %s2702_s24, 1  ;;  %s2702_s24 = sphi %s2745_s24, %s17_s24  }
   0x2   : > { %p238_p1 = scmp.lt.s32.totalorder %s2702_s24, 5 }
   0x4   : > { %p239_p2 = pnand %p2156_p0, %p238_p1 }
   0x5   : > { %v2607_v0 = vld [vmem:[%s3271_s1] sm:$0xff] (!%p239_p2)   ;;  %s2157_s28 = sshll.u32 (!%p239_p2), %s2152_s25, 4  ;;  %v2620_v2 = vld [vmem:[%s3273_s3 + $0xc] ss:$16 sps:$4 sm:$0xff] (!%p239_p2)   ;;  %v2618_v5 = vld [vmem:[%s3273_s3 + $0x8] ss:$16 sps:$4 sm:$0xff] (!%p239_p2)  }
   0x6   : > { %242 = sbr.rel (%p239_p2) target bundleno = 770 (0x302), region = 48  ;;  %p272_p3 = scmp.lt.s32.totalorder (!%p239_p2), %s2157_s28, 63  ;;  %v2616_v1 = vld [vmem:[%s3273_s3 + $0x4] ss:$16 sps:$4 sm:$0xff] (!%p239_p2)   ;;  %2452 = vmatprep.subr.bf16.mxu0 (!%p239_p2), %v2607_v0  ;;  %v2621_v3 = vld [vmem:[%s3273_s3] ss:$16 sps:$4 sm:$0xff] (!%p239_p2)  }
   0x7   : > { %2453 = vmatpush3.bf16.msra.mxu0 (!%p239_p2), %v2607_v0  ;;  %716 = vmatprep.subr.bf16.mxu1 (!%p239_p2), %v2616_v1  ;;  %v2622_v4 = vld [vmem:[%s3273_s3 + $0x24] ss:$16 sps:$4 sm:$0xff] (!%p239_p2)   ;;  %vm356_vm0 = vcmask (!%p239_p2), 130048   ;;  %v2626_v6 = vld [vmem:[%s3273_s3 + $0x2c] ss:$16 sps:$4 sm:$0xff] (!%p239_p2)   ;;  %v2704_v41 = vmov (!%p239_p2), 0  }
   0x8   : > { %829 = vmatprep.subr.bf16.mxu0 (!%p239_p2), %v2620_v2  ;;  %717 = vmatpush1.bf16.msra.mxu1 (!%p239_p2), %v2621_v3  ;;  %v2627_v7 = vld [vmem:[%s3273_s3 + $0x20] ss:$16 sps:$4 sm:$0xff] (!%p239_p2)   ;;  %v2624_v11 = vld [vmem:[%s3273_s3 + $0x28] ss:$16 sps:$4 sm:$0xff] (!%p239_p2)   ;;  %v2628_v14 = vld [vmem:[%s3273_s3 + $0x44] ss:$16 sps:$4 sm:$0xff] (!%p239_p2)  }
   0x9   : > { %718 = vmatprep.subr.bf16.mxu1 (!%p239_p2), %v2622_v4  ;;  %v2630_v15 = vld [vmem:[%s3273_s3 + $0x48] ss:$16 sps:$4 sm:$0xff] (!%p239_p2)   ;;  %v2632_v16 = vld [vmem:[%s3273_s3 + $0x4c] ss:$16 sps:$4 sm:$0xff] (!%p239_p2)   ;;  %v2633_v17 = vld [vmem:[%s3273_s3 + $0x40] ss:$16 sps:$4 sm:$0xff] (!%p239_p2)   ;;  %748 = vmatprep.mubr.bf16.mxu1 (!%p239_p2), %v2704_v41 }
   0xa   : > { %v2634_v18 = vld [vmem:[%s3273_s3 + $0x64] ss:$16 sps:$4 sm:$0xff] (!%p239_p2)   ;;  %v2636_v19 = vld [vmem:[%s3273_s3 + $0x68] ss:$16 sps:$4 sm:$0xff] (!%p239_p2)   ;;  %v2638_v20 = vld [vmem:[%s3273_s3 + $0x6c] ss:$16 sps:$4 sm:$0xff] (!%p239_p2)  }
   0xb   : > { %v2639_v21 = vld [vmem:[%s3273_s3 + $0x60] ss:$16 sps:$4 sm:$0xff] (!%p239_p2)   ;;  %v2640_v22 = vld [vmem:[%s3273_s3 + $0x84] ss:$16 sps:$4 sm:$0xff] (!%p239_p2)   ;;  %v2644_v24 = vld [vmem:[%s3273_s3 + $0x8c] ss:$16 sps:$4 sm:$0xff] (!%p239_p2)  }
   0xc   : > { %719 = vmatpush1.bf16.msra.mxu1 (!%p239_p2), %v2627_v7  ;;  %v2645_v26 = vld [vmem:[%s3273_s3 + $0x80] ss:$16 sps:$4 sm:$0xff] (!%p239_p2)   ;;  %v2642_v27 = vld [vmem:[%s3273_s3 + $0x88] ss:$16 sps:$4 sm:$0xff] (!%p239_p2)   ;;  %v2646_v28 = vld [vmem:[%s3273_s3 + $0xa4] ss:$16 sps:$4 sm:$0xff] (!%p239_p2)  }
   0xd   : > { %s3279_s28 = smov (!%p272_p3, %s2157_s28), 63  ;;  %720 = vmatprep.subr.bf16.mxu1 %v2628_v14  ;;  %v2650_v29 = vld [vmem:[%s3273_s3 + $0xac] ss:$16 sps:$4 sm:$0xff]   ;;  %v2651_v30 = vld [vmem:[%s3273_s3 + $0xa0] ss:$16 sps:$4 sm:$0xff]  }
   0xe   : > { %s2158_s14 = sshll.u32 %s3279_s28, 2  ;;  %v2648_v31 = vld [vmem:[%s3273_s3 + $0xa8] ss:$16 sps:$4 sm:$0xff]   ;;  %v2652_v33 = vld [vmem:[%s3273_s3 + $0xc4] ss:$16 sps:$4 sm:$0xff]   ;;  %s2314_s20 = sshll.u32 %s3279_s28, 4 }
   0xf   : > { %s2777_s19 = scalar_lea.vmem %s3270_s0, %s2158_s14  ;;  %v2656_v34 = vld [vmem:[%s3273_s3 + $0xcc] ss:$16 sps:$4 sm:$0xff]   ;;  %v2654_v35 = vld [vmem:[%s3273_s3 + $0xc8] ss:$16 sps:$4 sm:$0xff]   ;;  %v2657_v36 = vld [vmem:[%s3273_s3 + $0xc0] ss:$16 sps:$4 sm:$0xff]   ;;  %s3142_s28 = scalar_lea.vmem %s3277_s7, %s2314_s20 }
  0x10   : > { %v2608_v8 = vld [vmem:[%s2777_s19] sm:$0xff]   ;;  %v2609_v9 = vld [vmem:[%s2777_s19 + $0x8] sm:$0xff]   ;;  %v2610_v10 = vld [vmem:[%s2777_s19 + $0x10] sm:$0xff]   ;;  %721 = vmatpush1.bf16.msra.mxu1 %v2633_v17 }
  0x11   : > { %2454 = vmatprep.mubr.msk.bf16.mxu0 %vm356_vm0, %v2608_v8  ;;  %v2611_v12 = vld [vmem:[%s2777_s19 + $0x18] sm:$0xff]   ;;  %v2612_v13 = vld [vmem:[%s2777_s19 + $0x20] sm:$0xff]   ;;  %722 = vmatprep.subr.bf16.mxu1 %v2634_v18  ;;  %v2613_v23 = vld [vmem:[%s2777_s19 + $0x28] sm:$0xff]  }
  0x12   : > { %2455 = vmatmul.mubr.msk.bf16.vlgmr.msra.gmra.mrb[0].mxu0 %vm356_vm0, %v2609_v9  ;;  %v2614_v25 = vld [vmem:[%s2777_s19 + $0x30] sm:$0xff]   ;;  %v2615_v32 = vld [vmem:[%s2777_s19 + $0x38] sm:$0xff]   ;;  %v2664_v42 = vld [vmem:[%s3275_s5] sm:$0xff]  }
  0x13   : > { %2458 = vmatprep.mubr.msk.bf16.mxu0 %vm356_vm0, %v2610_v10  ;;  %830 = vmatpush1.bf16.msra.mxu0 %v2618_v5  ;;  %v2658_v37 = vld [vmem:[%s3273_s3 + $0xe4] ss:$16 sps:$4 sm:$0xff]   ;;  %v2662_v38 = vld [vmem:[%s3273_s3 + $0xec] ss:$16 sps:$4 sm:$0xff]   ;;  %v2660_v39 = vld [vmem:[%s3273_s3 + $0xe8] ss:$16 sps:$4 sm:$0xff]  }
  0x14   : > { %831 = vmatprep.subr.bf16.mxu0 %v2626_v6  ;;  %723 = vmatpush1.bf16.msra.mxu1 %v2639_v21  ;;  %v2663_v40 = vld [vmem:[%s3273_s3 + $0xe0] ss:$16 sps:$4 sm:$0xff]   ;;  %v2666_v62 = vld [vmem:[%s3275_s5 + $0x8] sm:$0xff]   ;;  %v2671_v17 = vld [vmem:[%s3275_s5 + $0x18] sm:$0xff]  }
  0x15   : > { %724 = vmatprep.subr.bf16.mxu1 %v2640_v22  ;;  %v2665_v43 = vld [vmem:[%s3275_s5] sm:$0xff]   ;;  %v2667_v63 = vld [vmem:[%s3275_s5 + $0x8] sm:$0xff]   ;;  %v2668_v8 = vld [vmem:[%s3275_s5 + $0x10] sm:$0xff]  }
  0x16   : > { %v2887_v44 = vld [vmem:[%s3272_s2] ss:$0 sm:$0xff]  ;;  %v2669_v9 = vld [vmem:[%s3275_s5 + $0x10] sm:$0xff]  }
  0x17   : > { %832 = vmatpush1.bf16.msra.mxu0 %v2624_v11 }
  0x18   : > { %833 = vmatprep.subr.bf16.mxu0 %v2632_v16  ;;  %725 = vmatpush1.bf16.msra.mxu1 %v2645_v26  ;;  %v2670_v16 = vld [vmem:[%s3275_s5 + $0x18] sm:$0xff]  }
  0x19   : > { %726 = vmatprep.subr.bf16.mxu1 %v2646_v28 }
  0x1a   : > { %2459 = vmatmul.mubr.msk.bf16.gmra.mrb[4].mxu0 %vm356_vm0, %v2611_v12 }
  0x1b   : > { %2462 = vmatprep.mubr.msk.bf16.mxu0 %vm356_vm0, %v2612_v13  ;;  %834 = vmatpush1.bf16.msra.mxu0 %v2630_v15 }
  0x1c   : > { %835 = vmatprep.subr.bf16.mxu0 %v2638_v20  ;;  %727 = vmatpush1.bf16.msra.mxu1 %v2651_v30 }
  0x1d   : > { %728 = vmatprep.subr.bf16.mxu1 %v2652_v33 }
  0x1f   : > { %836 = vmatpush1.bf16.msra.mxu0 %v2636_v19 }
  0x20   : > { %837 = vmatprep.subr.bf16.mxu0 %v2644_v24  ;;  %729 = vmatpush1.bf16.msra.mxu1 %v2657_v36 }
  0x21   : > { %730 = vmatprep.subr.bf16.mxu1 %v2658_v37 }
  0x22   : > { %2463 = vmatmul.mubr.msk.bf16.gmra.mrb[8].mxu0 %vm356_vm0, %v2613_v23 }
  0x23   : > { %2466 = vmatprep.mubr.msk.bf16.mxu0 %vm356_vm0, %v2614_v25  ;;  %838 = vmatpush1.bf16.msra.mxu0 %v2642_v27 }
  0x24   : > { %839 = vmatprep.subr.bf16.mxu0 %v2650_v29  ;;  %731 = vmatpush1.bf16.msra.mxu1 %v2663_v40 }
  0x25   : > { %2470 = vmatprep.subr.bf16.mxu1 %v2664_v42 }
  0x27   : > { %840 = vmatpush1.bf16.msra.mxu0 %v2648_v31 }
  0x28   : > { %841 = vmatprep.subr.bf16.mxu0 %v2656_v34 }
  0x2a   : > { %2467 = vmatmul.mubr.msk.bf16.gmra.mrb[12].mxu0 %vm356_vm0, %v2615_v32 }
  0x2b   : > { %842 = vmatpush1.bf16.msra.mxu0 %v2654_v35  ;;  %861 = vmatprep.mubr.bf16.mxu0 %v2704_v41 }
  0x2c   : > { %843 = vmatprep.subr.bf16.mxu0 %v2662_v38 }
  0x2f   : > { %844 = vmatpush1.bf16.msra.mxu0 %v2660_v39 }
  0x30   : > { %2502 = vmatprep.subr.bf16.mxu0 %v2665_v43 }
  0xe5   : > { %v2456_v45 = vpop.f32.mrb[0].mxu0 }
  0xe6   : > { %v424_v46 = vadd.f32 %v2456_v45, %v2887_v44  ;;  %v415_v47 = vpop.f32.mrb[1].mxu0  ;;  %v2673_v45 = vld [vmem:[%s3275_s5 + $0x20] sm:$0xff]  }
  0xe7   : > { %v416_v48 = vadd.f32 %v2887_v44, %v415_v47  ;;  %v2457_v49 = vpop.f32.mrb[2].mxu0  ;;  %v2676_v47 = vld [vmem:[%s3275_s5 + $0x30] sm:$0xff]  }
  0xe8   : > { %v427_v50 = vadd.f32 %v2457_v49, %v2887_v44  ;;  %v418_v51 = vpop.f32.mrb[3].mxu0  ;;  %v480_v53 = vmax.f32 %v424_v46, 0.0  ;;  %v2674_v46 = vld [vmem:[%s3275_s5 + $0x28] sm:$0xff]   ;;  %v2678_v49 = vld [vmem:[%s3275_s5 + $0x38] sm:$0xff]  }
  0xe9   : > { %v419_v52 = vadd.f32 %v2887_v44, %v418_v51  ;;  %v478_v55 = vmax.f32 %v416_v48, 0.0  ;;  %v2677_v48 = vld [vmem:[%s3275_s5 + $0x30] sm:$0xff]   ;;  %v2964_v51 = vld [vmem:[%s3275_s5] sm:$0xff]  }
  0xea   : > { %v481_v54 = vmax.f32 %v427_v50, 0.0  ;;  %v2679_v50 = vld [vmem:[%s3275_s5 + $0x38] sm:$0xff]  }
  0xeb   : > { %v479_v56 = vmax.f32 %v419_v52, 0.0  ;;  %v2969_v52 = vld [vmem:[%s3275_s5] sm:$0xff]  }
  0xec   : > { %v495_v57 = vpack.c.bf16 %v481_v54, %v480_v53  ;;  %v536_v53 = vlaneseq }
  0xed   : > { %v494_v58 = vpack.c.bf16 %v479_v56, %v478_v55  ;;  %v2460_v59 = vpop.f32.mrb[4].mxu0 }
  0xee   : > { %v440_v60 = vadd.f32 %v2460_v59, %v2887_v44  ;;  %v431_v61 = vpop.f32.mrb[5].mxu0  ;;  %v537_v54 = vshrl.u32 %v536_v53, 7 }
  0xef   : > { %749 = vmatmul.mubr.bf16.vlgmr.msra.gmra.mrb[0].mxu1 %v494_v58  ;;  %862 = vmatmul.mubr.bf16.vlgmr.msra.gmra.mrb[16].mxu0 %v494_v58  ;;  %v432_v0 = vadd.f32 %v2887_v44, %v431_v61  ;;  %v2461_v1 = vpop.f32.mrb[6].mxu0 }
  0xf0   : > { %v484_v2 = vmax.f32 %v440_v60, 0.0  ;;  %v443_v3 = vadd.f32 %v2461_v1, %v2887_v44  ;;  %v434_v4 = vpop.f32.mrb[7].mxu0  ;;  %758 = vmatprep.mubr.bf16.mxu1 %v2704_v41  ;;  %871 = vmatprep.mubr.bf16.mxu0 %v2704_v41  ;;  %v538_v55 = vsub.s32 0, %v537_v54  ;;  %v546_v56 = vsub.s32 2, %v537_v54 }
  0xf1   : > { %v482_v5 = vmax.f32 %v432_v0, 0.0  ;;  %v435_v6 = vadd.f32 %v2887_v44, %v434_v4  ;;  %2471 = vmatpush3.bf16.msra.mxu1 %v2664_v42  ;;  %2503 = vmatpush3.bf16.msra.mxu0 %v2665_v43  ;;  %v542_v58 = vsub.s32 1, %v537_v54  ;;  %v550_v59 = vsub.s32 3, %v537_v54 }
  0xf2   : > { %v485_v7 = vmax.f32 %v443_v3, 0.0  ;;  %2472 = vmatprep.subr.bf16.mxu1 %v2666_v62  ;;  %2504 = vmatprep.subr.bf16.mxu0 %v2667_v63 }
  0xf3   : > { %v483_v10 = vmax.f32 %v435_v6, 0.0 }
  0xf4   : > { %v497_v11 = vpack.c.bf16 %v485_v7, %v484_v2 }
  0xf5   : > { %v496_v12 = vpack.c.bf16 %v483_v10, %v482_v5  ;;  %v2464_v13 = vpop.f32.mrb[8].mxu0  ;;  %2473 = vmatpush3.bf16.msra.mxu1 %v2666_v62  ;;  %2505 = vmatpush3.bf16.msra.mxu0 %v2667_v63 }
  0xf6   : > { %v456_v14 = vadd.f32 %v2464_v13, %v2887_v44  ;;  %v447_v15 = vpop.f32.mrb[9].mxu0  ;;  %2474 = vmatprep.subr.bf16.mxu1 %v2668_v8  ;;  %2506 = vmatprep.subr.bf16.mxu0 %v2669_v9 }
  0xf7   : > { %759 = vmatmul.mubr.bf16.gmra.mrb[4].mxu1 %v495_v57  ;;  %872 = vmatmul.mubr.bf16.gmra.mrb[20].mxu0 %v495_v57  ;;  %v448_v18 = vadd.f32 %v2887_v44, %v447_v15  ;;  %v2465_v19 = vpop.f32.mrb[10].mxu0  ;;  %v534_v57 = vld [vmem:[%s3274_s4] sm:$0xf] }
  0xf8   : > { %768 = vmatprep.mubr.bf16.mxu1 %v2704_v41  ;;  %881 = vmatprep.mubr.bf16.mxu0 %v2704_v41  ;;  %v488_v20 = vmax.f32 %v456_v14, 0.0  ;;  %v459_v21 = vadd.f32 %v2465_v19, %v2887_v44  ;;  %v450_v22 = vpop.f32.mrb[11].mxu0  ;;  %v2976_v60 = vrot.slane %v534_v57, %v538_v55  ;;  %v2978_v61 = vrot.slane %v534_v57, %v546_v56  ;;  %v2682_v56 = vld [vmem:[%s3275_s5 + $0x8] sm:$0xff]  }
  0xf9   : > { %v486_v23 = vmax.f32 %v448_v18, 0.0  ;;  %v451_v24 = vadd.f32 %v2887_v44, %v450_v22  ;;  %2475 = vmatpush3.bf16.msra.mxu1 %v2668_v8  ;;  %2507 = vmatpush3.bf16.msra.mxu0 %v2669_v9  ;;  %v2980_v62 = vrot.slane %v534_v57, %v542_v58  ;;  %v2982_v63 = vrot.slane %v534_v57, %v550_v59 }
  0xfa   : > { %v489_v25 = vmax.f32 %v459_v21, 0.0  ;;  %2476 = vmatprep.subr.bf16.mxu1 %v2670_v16  ;;  %2508 = vmatprep.subr.bf16.mxu0 %v2671_v17 }
  0xfb   : > { %v487_v26 = vmax.f32 %v451_v24, 0.0 }
  0xfc   : > { %v499_v27 = vpack.c.bf16 %v489_v25, %v488_v20 }
  0xfd   : > { %v498_v28 = vpack.c.bf16 %v487_v26, %v486_v23  ;;  %v2468_v29 = vpop.f32.mrb[12].mxu0  ;;  %2477 = vmatpush3.bf16.msra.mxu1 %v2670_v16  ;;  %2509 = vmatpush3.bf16.msra.mxu0 %v2671_v17 }
  0xfe   : > { %v472_v30 = vadd.f32 %v2468_v29, %v2887_v44  ;;  %v463_v31 = vpop.f32.mrb[13].mxu0  ;;  %2510 = vmatprep.subr.bf16.mxu0 %v2673_v45 }
  0xff   : > { %769 = vmatmul.mubr.bf16.gmra.mrb[8].mxu1 %v496_v12  ;;  %882 = vmatmul.mubr.bf16.gmra.mrb[24].mxu0 %v496_v12  ;;  %v464_v32 = vadd.f32 %v2887_v44, %v463_v31  ;;  %v2469_v33 = vpop.f32.mrb[14].mxu0 }
 0x100   : > { %778 = vmatprep.mubr.bf16.mxu1 %v2704_v41  ;;  %891 = vmatprep.mubr.bf16.mxu0 %v2704_v41  ;;  %v492_v34 = vmax.f32 %v472_v30, 0.0  ;;  %v475_v35 = vadd.f32 %v2469_v33, %v2887_v44  ;;  %v466_v36 = vpop.f32.mrb[15].mxu0 }
 0x101   : > { %v490_v37 = vmax.f32 %v464_v32, 0.0  ;;  %v467_v38 = vadd.f32 %v2887_v44, %v466_v36  ;;  %v2672_v44 = vld [vmem:[%s3275_s5 + $0x20] sm:$0xff]   ;;  %2511 = vmatpush3.bf16.msra.mxu0 %v2673_v45 }
 0x102   : > { %v493_v39 = vmax.f32 %v475_v35, 0.0  ;;  %2478 = vmatprep.subr.bf16.mxu1 %v2672_v44 }
 0x103   : > { %v491_v40 = vmax.f32 %v467_v38, 0.0  ;;  %2479 = vmatpush3.bf16.msra.mxu1 %v2672_v44 }
 0x104   : > { %v501_v42 = vpack.c.bf16 %v493_v39, %v492_v34  ;;  %2480 = vmatprep.subr.bf16.mxu1 %v2674_v46 }
 0x105   : > { %v500_v43 = vpack.c.bf16 %v491_v40, %v490_v37 }
 0x107   : > { %779 = vmatmul.mubr.bf16.gmra.mrb[12].mxu1 %v497_v11  ;;  %892 = vmatmul.mubr.bf16.gmra.mrb[28].mxu0 %v497_v11 }
 0x108   : > { %788 = vmatprep.mubr.bf16.mxu1 %v2704_v41  ;;  %901 = vmatprep.mubr.bf16.mxu0 %v2704_v41 }
 0x109   : > { %2481 = vmatpush3.bf16.msra.mxu1 %v2674_v46 }
 0x10a   : > { %2482 = vmatprep.subr.bf16.mxu1 %v2676_v47 }
 0x10d   : > { %2483 = vmatpush3.bf16.msra.mxu1 %v2676_v47 }
 0x10e   : > { %2484 = vmatprep.subr.bf16.mxu1 %v2678_v49 }
 0x10f   : > { %789 = vmatmul.mubr.bf16.gmra.mrb[16].mxu1 %v498_v28  ;;  %902 = vmatmul.mubr.bf16.gmra.mrb[32].mxu0 %v498_v28 }
 0x110   : > { %798 = vmatprep.mubr.bf16.mxu1 %v2704_v41  ;;  %911 = vmatprep.mubr.bf16.mxu0 %v2704_v41 }
 0x111   : > { %2485 = vmatpush3.bf16.msra.mxu1 %v2678_v49 }
 0x112   : > { %2534 = vmatprep.subr.bf16.mxu1 %v2964_v51 }
 0x117   : > { %799 = vmatmul.mubr.bf16.gmra.mrb[20].mxu1 %v499_v27  ;;  %912 = vmatmul.mubr.bf16.gmra.mrb[36].mxu0 %v499_v27 }
 0x118   : > { %808 = vmatprep.mubr.bf16.mxu1 %v2704_v41  ;;  %921 = vmatprep.mubr.bf16.mxu0 %v2704_v41 }
 0x11f   : > { %809 = vmatmul.mubr.bf16.gmra.mrb[24].mxu1 %v500_v43  ;;  %922 = vmatmul.mubr.bf16.gmra.mrb[40].mxu0 %v500_v43 }
 0x120   : > { %818 = vmatprep.mubr.bf16.mxu1 %v2704_v41  ;;  %931 = vmatprep.mubr.bf16.mxu0 %v2704_v41  ;;  %v2675_v41 = vld [vmem:[%s3275_s5 + $0x28] sm:$0xff]  }
 0x121   : > { %2512 = vmatprep.subr.bf16.mxu0 %v2675_v41 }
 0x122   : > { %2513 = vmatpush3.bf16.msra.mxu0 %v2675_v41 }
 0x123   : > { %2514 = vmatprep.subr.bf16.mxu0 %v2677_v48 }
 0x126   : > { %2515 = vmatpush3.bf16.msra.mxu0 %v2677_v48 }
 0x127   : > { %819 = vmatmul.mubr.bf16.gmra.mrb[28].mxu1 %v501_v42  ;;  %932 = vmatmul.mubr.bf16.gmra.mrb[44].mxu0 %v501_v42 }
 0x128   : > { %2516 = vmatprep.subr.bf16.mxu0 %v2679_v50 }
 0x12a   : > { %2517 = vmatpush3.bf16.msra.mxu0 %v2679_v50 }
 0x12b   : > { %2566 = vmatprep.subr.bf16.mxu0 %v2969_v52 }
 0x1c2   : > { %v750_v0 = vpop.f32.mrb[0].mxu1  ;;  %v863_v1 = vpop.f32.mrb[16].mxu0 }
 0x1c3   : > { %v751_v2 = vadd.f32 %v750_v0, %v2976_v60  ;;  %v864_v3 = vadd.f32 %v863_v1, %v2978_v61  ;;  %v752_v4 = vpop.f32.mrb[1].mxu1  ;;  %v865_v5 = vpop.f32.mrb[17].mxu0  ;;  %v2683_v1 = vld [vmem:[%s3275_s5 + $0x8] sm:$0xff]  }
 0x1c4   : > { %v753_v6 = vadd.f32 %v752_v4, %v2980_v62  ;;  %v866_v7 = vadd.f32 %v865_v5, %v2982_v63  ;;  %v754_v8 = vpop.f32.mrb[2].mxu1  ;;  %v867_v9 = vpop.f32.mrb[18].mxu0 }
 0x1c5   : > { %v755_v10 = vadd.f32 %v754_v8, %v2976_v60  ;;  %v868_v11 = vadd.f32 %v867_v9, %v2978_v61  ;;  %v756_v12 = vpop.f32.mrb[3].mxu1  ;;  %v869_v13 = vpop.f32.mrb[19].mxu0  ;;  %v942_v16 = vmax.f32 %v751_v2, 0.0  ;;  %v944_v17 = vmax.f32 %v864_v3, 0.0 }
 0x1c6   : > { %v757_v14 = vadd.f32 %v756_v12, %v2980_v62  ;;  %v870_v15 = vadd.f32 %v869_v13, %v2982_v63  ;;  %v943_v20 = vmax.f32 %v753_v6, 0.0  ;;  %v945_v21 = vmax.f32 %v866_v7, 0.0 }
 0x1c7   : > { %v946_v18 = vmax.f32 %v755_v10, 0.0  ;;  %v948_v19 = vmax.f32 %v868_v11, 0.0 }
 0x1c8   : > { %v947_v22 = vmax.f32 %v757_v14, 0.0  ;;  %v949_v23 = vmax.f32 %v870_v15, 0.0  ;;  %v2684_v14 = vld [vmem:[%s3275_s5 + $0x10] sm:$0xff]  }
 0x1c9   : > { %v1006_v24 = vpack.c.bf16 %v946_v18, %v942_v16  ;;  %v2992_v25 = vpack.c.bf16 %v948_v19, %v944_v17 }
 0x1ca   : > { %v1007_v26 = vpack.c.bf16 %v947_v22, %v943_v20  ;;  %v2994_v27 = vpack.c.bf16 %v949_v23, %v945_v21  ;;  %v760_v28 = vpop.f32.mrb[4].mxu1  ;;  %v873_v29 = vpop.f32.mrb[20].mxu0 }
 0x1cb   : > { %v761_v30 = vadd.f32 %v760_v28, %v2976_v60  ;;  %v874_v31 = vadd.f32 %v873_v29, %v2978_v61  ;;  %v762_v32 = vpop.f32.mrb[5].mxu1  ;;  %v875_v33 = vpop.f32.mrb[21].mxu0  ;;  %2486 = vmatprep.mubr.bf16.mxu1 %v1006_v24  ;;  %v2686_v28 = vld [vmem:[%s3275_s5 + $0x18] sm:$0xff]  }
 0x1cc   : > { %v763_v34 = vadd.f32 %v762_v32, %v2980_v62  ;;  %v876_v35 = vadd.f32 %v875_v33, %v2982_v63  ;;  %v764_v36 = vpop.f32.mrb[6].mxu1  ;;  %v877_v37 = vpop.f32.mrb[22].mxu0  ;;  %2518 = vmatprep.mubr.bf16.mxu0 %v1007_v26  ;;  %v2687_v33 = vld [vmem:[%s3275_s5 + $0x18] sm:$0xff]  }
 0x1cd   : > { %v765_v38 = vadd.f32 %v764_v36, %v2976_v60  ;;  %v878_v39 = vadd.f32 %v877_v37, %v2978_v61  ;;  %v766_v40 = vpop.f32.mrb[7].mxu1  ;;  %v879_v42 = vpop.f32.mrb[23].mxu0  ;;  %v950_v45 = vmax.f32 %v761_v30, 0.0  ;;  %v952_v46 = vmax.f32 %v874_v31, 0.0 }
 0x1ce   : > { %v767_v43 = vadd.f32 %v766_v40, %v2980_v62  ;;  %v880_v44 = vadd.f32 %v879_v42, %v2982_v63  ;;  %v951_v48 = vmax.f32 %v763_v34, 0.0  ;;  %v953_v49 = vmax.f32 %v876_v35, 0.0 }
 0x1cf   : > { %v954_v41 = vmax.f32 %v765_v38, 0.0  ;;  %v956_v47 = vmax.f32 %v878_v39, 0.0 }
 0x1d0   : > { %v955_v50 = vmax.f32 %v767_v43, 0.0  ;;  %v957_v53 = vmax.f32 %v880_v44, 0.0 }
 0x1d1   : > { %v1010_v54 = vpack.c.bf16 %v954_v41, %v950_v45  ;;  %v3004_v55 = vpack.c.bf16 %v956_v47, %v952_v46  ;;  %v2688_v41 = vld [vmem:[%s3275_s5 + $0x20] sm:$0xff]  }
 0x1d2   : > { %v1011_v57 = vpack.c.bf16 %v955_v50, %v951_v48  ;;  %v3009_v58 = vpack.c.bf16 %v957_v53, %v953_v49  ;;  %v770_v59 = vpop.f32.mrb[8].mxu1  ;;  %v883_v0 = vpop.f32.mrb[24].mxu0  ;;  %v2689_v49 = vld [vmem:[%s3275_s5 + $0x20] sm:$0xff]  }
 0x1d3   : > { %v771_v2 = vadd.f32 %v770_v59, %v2976_v60  ;;  %v884_v3 = vadd.f32 %v883_v0, %v2978_v61  ;;  %v772_v4 = vpop.f32.mrb[9].mxu1  ;;  %v885_v5 = vpop.f32.mrb[25].mxu0  ;;  %2487 = vmatmul.mubr.bf16.vlgmr.msra.gmra.mrb[32].mxu1 %v1010_v54 }
 0x1d4   : > { %v773_v6 = vadd.f32 %v772_v4, %v2980_v62  ;;  %v886_v7 = vadd.f32 %v885_v5, %v2982_v63  ;;  %v774_v8 = vpop.f32.mrb[10].mxu1  ;;  %v887_v9 = vpop.f32.mrb[26].mxu0  ;;  %2519 = vmatmul.mubr.bf16.vlgmr.msra.gmra.mrb[48].mxu0 %v1011_v57  ;;  %2535 = vmatpush3.bf16.msra.mxu1 %v2964_v51  ;;  %v2685_v51 = vld [vmem:[%s3275_s5 + $0x10] sm:$0xff]   ;;  %v2690_v4 = vld [vmem:[%s3275_s5 + $0x28] sm:$0xff]  }
 0x1d5   : > { %v775_v10 = vadd.f32 %v774_v8, %v2976_v60  ;;  %v888_v11 = vadd.f32 %v887_v9, %v2978_v61  ;;  %v776_v12 = vpop.f32.mrb[11].mxu1  ;;  %v889_v13 = vpop.f32.mrb[27].mxu0  ;;  %2567 = vmatpush3.bf16.msra.mxu0 %v2969_v52  ;;  %2536 = vmatprep.subr.bf16.mxu1 %v2682_v56  ;;  %v958_v17 = vmax.f32 %v771_v2, 0.0  ;;  %v960_v18 = vmax.f32 %v884_v3, 0.0  ;;  %v2691_v9 = vld [vmem:[%s3275_s5 + $0x28] sm:$0xff]  }
 0x1d6   : > { %v777_v15 = vadd.f32 %v776_v12, %v2980_v62  ;;  %v890_v16 = vadd.f32 %v889_v13, %v2982_v63  ;;  %2568 = vmatprep.subr.bf16.mxu0 %v2683_v1  ;;  %v959_v21 = vmax.f32 %v773_v6, 0.0  ;;  %v961_v52 = vmax.f32 %v886_v7, 0.0 }
 0x1d7   : > { %v962_v19 = vmax.f32 %v775_v10, 0.0  ;;  %v964_v20 = vmax.f32 %v888_v11, 0.0 }
 0x1d8   : > { %v963_v22 = vmax.f32 %v777_v15, 0.0  ;;  %v965_v23 = vmax.f32 %v890_v16, 0.0  ;;  %2537 = vmatpush3.bf16.msra.mxu1 %v2682_v56 }
 0x1d9   : > { %v1014_v24 = vpack.c.bf16 %v962_v19, %v958_v17  ;;  %v3030_v26 = vpack.c.bf16 %v964_v20, %v960_v18  ;;  %2569 = vmatpush3.bf16.msra.mxu0 %v2683_v1  ;;  %2538 = vmatprep.subr.bf16.mxu1 %v2684_v14 }
 0x1da   : > { %v1015_v29 = vpack.c.bf16 %v963_v22, %v959_v21  ;;  %v3035_v30 = vpack.c.bf16 %v965_v23, %v961_v52  ;;  %v780_v31 = vpop.f32.mrb[12].mxu1  ;;  %v893_v32 = vpop.f32.mrb[28].mxu0  ;;  %2570 = vmatprep.subr.bf16.mxu0 %v2685_v51  ;;  %v2692_v21 = vld [vmem:[%s3275_s5 + $0x30] sm:$0xff]  }
 0x1db   : > { %v781_v34 = vadd.f32 %v780_v31, %v2976_v60  ;;  %v894_v35 = vadd.f32 %v893_v32, %v2978_v61  ;;  %v782_v36 = vpop.f32.mrb[13].mxu1  ;;  %v895_v37 = vpop.f32.mrb[29].mxu0  ;;  %2490 = vmatprep.mubr.bf16.mxu1 %v1014_v24  ;;  %v2693_v23 = vld [vmem:[%s3275_s5 + $0x30] sm:$0xff]  }
 0x1dc   : > { %v783_v38 = vadd.f32 %v782_v36, %v2980_v62  ;;  %v896_v39 = vadd.f32 %v895_v37, %v2982_v63  ;;  %v784_v40 = vpop.f32.mrb[14].mxu1  ;;  %v897_v42 = vpop.f32.mrb[30].mxu0  ;;  %2522 = vmatprep.mubr.bf16.mxu0 %v1015_v29  ;;  %2539 = vmatpush3.bf16.msra.mxu1 %v2684_v14 }
 0x1dd   : > { %v785_v43 = vadd.f32 %v784_v40, %v2976_v60  ;;  %v898_v44 = vadd.f32 %v897_v42, %v2978_v61  ;;  %v786_v45 = vpop.f32.mrb[15].mxu1  ;;  %v899_v46 = vpop.f32.mrb[31].mxu0  ;;  %2571 = vmatpush3.bf16.msra.mxu0 %v2685_v51  ;;  %2540 = vmatprep.subr.bf16.mxu1 %v2686_v28  ;;  %v966_v50 = vmax.f32 %v781_v34, 0.0  ;;  %v968_v53 = vmax.f32 %v894_v35, 0.0 }
 0x1de   : > { %v787_v47 = vadd.f32 %v786_v45, %v2980_v62  ;;  %v900_v48 = vadd.f32 %v899_v46, %v2982_v63  ;;  %2572 = vmatprep.subr.bf16.mxu0 %v2687_v33  ;;  %v967_v57 = vmax.f32 %v783_v38, 0.0  ;;  %v969_v59 = vmax.f32 %v896_v39, 0.0  ;;  %v2694_v38 = vld [vmem:[%s3275_s5 + $0x38] sm:$0xff]  }
 0x1df   : > { %v970_v54 = vmax.f32 %v785_v43, 0.0  ;;  %v972_v56 = vmax.f32 %v898_v44, 0.0  ;;  %v2695_v44 = vld [vmem:[%s3275_s5 + $0x38] sm:$0xff]  }
 0x1e0   : > { %v971_v0 = vmax.f32 %v787_v47, 0.0  ;;  %v973_v1 = vmax.f32 %v900_v48, 0.0  ;;  %2541 = vmatpush3.bf16.msra.mxu1 %v2686_v28 }
 0x1e1   : > { %v1018_v2 = vpack.c.bf16 %v970_v54, %v966_v50  ;;  %v3054_v3 = vpack.c.bf16 %v972_v56, %v968_v53  ;;  %2573 = vmatpush3.bf16.msra.mxu0 %v2687_v33  ;;  %2542 = vmatprep.subr.bf16.mxu1 %v2688_v41 }
 0x1e2   : > { %v1019_v5 = vpack.c.bf16 %v971_v0, %v967_v57  ;;  %v3059_v6 = vpack.c.bf16 %v973_v1, %v969_v59  ;;  %v790_v7 = vpop.f32.mrb[16].mxu1  ;;  %v903_v8 = vpop.f32.mrb[32].mxu0  ;;  %2574 = vmatprep.subr.bf16.mxu0 %v2689_v49 }
 0x1e3   : > { %v791_v10 = vadd.f32 %v790_v7, %v2976_v60  ;;  %v904_v11 = vadd.f32 %v903_v8, %v2978_v61  ;;  %v792_v12 = vpop.f32.mrb[17].mxu1  ;;  %v905_v13 = vpop.f32.mrb[33].mxu0  ;;  %2491 = vmatmul.mubr.bf16.gmra.mrb[36].mxu1 %v1018_v2 }
 0x1e4   : > { %v793_v14 = vadd.f32 %v792_v12, %v2980_v62  ;;  %v906_v15 = vadd.f32 %v905_v13, %v2982_v63  ;;  %v794_v16 = vpop.f32.mrb[18].mxu1  ;;  %v907_v51 = vpop.f32.mrb[34].mxu0  ;;  %2523 = vmatmul.mubr.bf16.gmra.mrb[52].mxu0 %v1019_v5  ;;  %2543 = vmatpush3.bf16.msra.mxu1 %v2688_v41 }
 0x1e5   : > { %v795_v17 = vadd.f32 %v794_v16, %v2976_v60  ;;  %v908_v18 = vadd.f32 %v907_v51, %v2978_v61  ;;  %v796_v19 = vpop.f32.mrb[19].mxu1  ;;  %v909_v20 = vpop.f32.mrb[35].mxu0  ;;  %2575 = vmatpush3.bf16.msra.mxu0 %v2689_v49  ;;  %2544 = vmatprep.subr.bf16.mxu1 %v2690_v4  ;;  %v974_v24 = vmax.f32 %v791_v10, 0.0  ;;  %v976_v28 = vmax.f32 %v904_v11, 0.0 }
 0x1e6   : > { %v797_v52 = vadd.f32 %v796_v19, %v2980_v62  ;;  %v910_v22 = vadd.f32 %v909_v20, %v2982_v63  ;;  %2576 = vmatprep.subr.bf16.mxu0 %v2691_v9  ;;  %v975_v32 = vmax.f32 %v793_v14, 0.0  ;;  %v977_v33 = vmax.f32 %v906_v15, 0.0 }
 0x1e7   : > { %v978_v29 = vmax.f32 %v795_v17, 0.0  ;;  %v980_v31 = vmax.f32 %v908_v18, 0.0 }
 0x1e8   : > { %v979_v34 = vmax.f32 %v797_v52, 0.0  ;;  %v981_v35 = vmax.f32 %v910_v22, 0.0  ;;  %2545 = vmatpush3.bf16.msra.mxu1 %v2690_v4 }
 0x1e9   : > { %v1022_v36 = vpack.c.bf16 %v978_v29, %v974_v24  ;;  %v3078_v37 = vpack.c.bf16 %v980_v31, %v976_v28  ;;  %2577 = vmatpush3.bf16.msra.mxu0 %v2691_v9  ;;  %2546 = vmatprep.subr.bf16.mxu1 %v2692_v21 }
 0x1ea   : > { %v1023_v39 = vpack.c.bf16 %v979_v34, %v975_v32  ;;  %v3083_v40 = vpack.c.bf16 %v981_v35, %v977_v33  ;;  %v800_v42 = vpop.f32.mrb[20].mxu1  ;;  %v913_v43 = vpop.f32.mrb[36].mxu0  ;;  %2578 = vmatprep.subr.bf16.mxu0 %v2693_v23 }
 0x1eb   : > { %v801_v45 = vadd.f32 %v800_v42, %v2976_v60  ;;  %v914_v46 = vadd.f32 %v913_v43, %v2978_v61  ;;  %v802_v41 = vpop.f32.mrb[21].mxu1  ;;  %v915_v47 = vpop.f32.mrb[37].mxu0  ;;  %2494 = vmatprep.mubr.bf16.mxu1 %v1022_v36 }
 0x1ec   : > { %v803_v48 = vadd.f32 %v802_v41, %v2980_v62  ;;  %v916_v49 = vadd.f32 %v915_v47, %v2982_v63  ;;  %v804_v50 = vpop.f32.mrb[22].mxu1  ;;  %v917_v53 = vpop.f32.mrb[38].mxu0  ;;  %2526 = vmatprep.mubr.bf16.mxu0 %v1023_v39  ;;  %2547 = vmatpush3.bf16.msra.mxu1 %v2692_v21 }
 0x1ed   : > { %v805_v54 = vadd.f32 %v804_v50, %v2976_v60  ;;  %v918_v56 = vadd.f32 %v917_v53, %v2978_v61  ;;  %v806_v57 = vpop.f32.mrb[23].mxu1  ;;  %v919_v59 = vpop.f32.mrb[39].mxu0  ;;  %2579 = vmatpush3.bf16.msra.mxu0 %v2693_v23  ;;  %2548 = vmatprep.subr.bf16.mxu1 %v2694_v38  ;;  %v982_v2 = vmax.f32 %v801_v45, 0.0  ;;  %v984_v4 = vmax.f32 %v914_v46, 0.0 }
 0x1ee   : > { %v807_v0 = vadd.f32 %v806_v57, %v2980_v62  ;;  %v920_v1 = vadd.f32 %v919_v59, %v2982_v63  ;;  %2580 = vmatprep.subr.bf16.mxu0 %v2695_v44  ;;  %v983_v8 = vmax.f32 %v803_v48, 0.0  ;;  %v985_v9 = vmax.f32 %v916_v49, 0.0 }
 0x1ef   : > { %v986_v5 = vmax.f32 %v805_v54, 0.0  ;;  %v988_v7 = vmax.f32 %v918_v56, 0.0 }
 0x1f0   : > { %v987_v10 = vmax.f32 %v807_v0, 0.0  ;;  %v989_v11 = vmax.f32 %v920_v1, 0.0  ;;  %2549 = vmatpush3.bf16.msra.mxu1 %v2694_v38 }
 0x1f1   : > { %v1026_v12 = vpack.c.bf16 %v986_v5, %v982_v2  ;;  %v3096_v13 = vpack.c.bf16 %v988_v7, %v984_v4  ;;  %2581 = vmatpush3.bf16.msra.mxu0 %v2695_v44 }
 0x1f2   : > { %v1027_v14 = vpack.c.bf16 %v987_v10, %v983_v8  ;;  %v3098_v15 = vpack.c.bf16 %v989_v11, %v985_v9  ;;  %v810_v16 = vpop.f32.mrb[24].mxu1  ;;  %v923_v51 = vpop.f32.mrb[40].mxu0 }
 0x1f3   : > { %v811_v17 = vadd.f32 %v810_v16, %v2976_v60  ;;  %v924_v18 = vadd.f32 %v923_v51, %v2978_v61  ;;  %v812_v19 = vpop.f32.mrb[25].mxu1  ;;  %v925_v20 = vpop.f32.mrb[41].mxu0  ;;  %2495 = vmatmul.mubr.bf16.gmra.mrb[40].mxu1 %v1026_v12 }
 0x1f4   : > { %v813_v21 = vadd.f32 %v812_v19, %v2980_v62  ;;  %v926_v52 = vadd.f32 %v925_v20, %v2982_v63  ;;  %v814_v22 = vpop.f32.mrb[26].mxu1  ;;  %v927_v23 = vpop.f32.mrb[42].mxu0  ;;  %2527 = vmatmul.mubr.bf16.gmra.mrb[56].mxu0 %v1027_v14 }
 0x1f5   : > { %v815_v24 = vadd.f32 %v814_v22, %v2976_v60  ;;  %v928_v28 = vadd.f32 %v927_v23, %v2978_v61  ;;  %v816_v29 = vpop.f32.mrb[27].mxu1  ;;  %v929_v31 = vpop.f32.mrb[43].mxu0  ;;  %v990_v34 = vmax.f32 %v811_v17, 0.0  ;;  %v992_v35 = vmax.f32 %v924_v18, 0.0 }
 0x1f6   : > { %v817_v32 = vadd.f32 %v816_v29, %v2980_v62  ;;  %v930_v33 = vadd.f32 %v929_v31, %v2982_v63  ;;  %v991_v39 = vmax.f32 %v813_v21, 0.0  ;;  %v993_v42 = vmax.f32 %v926_v52, 0.0 }
 0x1f7   : > { %v994_v36 = vmax.f32 %v815_v24, 0.0  ;;  %v996_v38 = vmax.f32 %v928_v28, 0.0 }
 0x1f8   : > { %v995_v43 = vmax.f32 %v817_v32, 0.0  ;;  %v997_v44 = vmax.f32 %v930_v33, 0.0 }
 0x1f9   : > { %v1030_v45 = vpack.c.bf16 %v994_v36, %v990_v34  ;;  %v1032_v46 = vpack.c.bf16 %v996_v38, %v992_v35 }
 0x1fa   : > { %v1031_v41 = vpack.c.bf16 %v995_v43, %v991_v39  ;;  %v1033_v47 = vpack.c.bf16 %v997_v44, %v993_v42  ;;  %v820_v48 = vpop.f32.mrb[28].mxu1  ;;  %v933_v49 = vpop.f32.mrb[44].mxu0 }
 0x1fb   : > { %v821_v50 = vadd.f32 %v820_v48, %v2976_v60  ;;  %v934_v53 = vadd.f32 %v933_v49, %v2978_v61  ;;  %v822_v54 = vpop.f32.mrb[29].mxu1  ;;  %v935_v56 = vpop.f32.mrb[45].mxu0  ;;  %2498 = vmatprep.mubr.bf16.mxu1 %v1030_v45 }
 0x1fc   : > { %v823_v57 = vadd.f32 %v822_v54, %v2980_v62  ;;  %v936_v59 = vadd.f32 %v935_v56, %v2982_v63  ;;  %v824_v0 = vpop.f32.mrb[30].mxu1  ;;  %v937_v1 = vpop.f32.mrb[46].mxu0  ;;  %2530 = vmatprep.mubr.bf16.mxu0 %v1031_v41 }
 0x1fd   : > { %v825_v2 = vadd.f32 %v824_v0, %v2976_v60  ;;  %v938_v4 = vadd.f32 %v937_v1, %v2978_v61  ;;  %v826_v5 = vpop.f32.mrb[31].mxu1  ;;  %v939_v7 = vpop.f32.mrb[47].mxu0  ;;  %v998_v10 = vmax.f32 %v821_v50, 0.0  ;;  %v1000_v11 = vmax.f32 %v934_v53, 0.0  ;;  %v3131_v61 = vld [vmem:[%s3276_s6] ss:$0 sm:$0xff] }
 0x1fe   : > { %v827_v8 = vadd.f32 %v826_v5, %v2980_v62  ;;  %v940_v9 = vadd.f32 %v939_v7, %v2982_v63  ;;  %v999_v16 = vmax.f32 %v823_v57, 0.0  ;;  %v1001_v51 = vmax.f32 %v936_v59, 0.0 }
 0x1ff   : > { %v1002_v12 = vmax.f32 %v825_v2, 0.0  ;;  %v1004_v14 = vmax.f32 %v938_v4, 0.0 }
 0x200   : > { %v1003_v17 = vmax.f32 %v827_v8, 0.0  ;;  %v1005_v18 = vmax.f32 %v940_v9, 0.0 }
 0x201   : > { %v1034_v19 = vpack.c.bf16 %v1002_v12, %v998_v10  ;;  %v1036_v20 = vpack.c.bf16 %v1004_v14, %v1000_v11 }
 0x202   : > { %v1035_v21 = vpack.c.bf16 %v1003_v17, %v999_v16  ;;  %v1037_v60 = vpack.c.bf16 %v1005_v18, %v1001_v51 }
 0x203   : > { %2499 = vmatmul.mubr.bf16.gmra.mrb[44].mxu1 %v1034_v19 }
 0x204   : > { %2531 = vmatmul.mubr.bf16.gmra.mrb[60].mxu0 %v1035_v21  ;;  %2550 = vmatprep.mubr.bf16.mxu1 %v2992_v25 }
 0x205   : > { %2582 = vmatprep.mubr.bf16.mxu0 %v2994_v27 }
 0x20b   : > { %2551 = vmatmul.mubr.bf16.vlgmr.msra.gmra.mrb[48].mxu1 %v3004_v55 }
 0x20c   : > { %2554 = vmatprep.mubr.bf16.mxu1 %v3030_v26  ;;  %2583 = vmatmul.mubr.bf16.vlgmr.msra.gmra.mrb[64].mxu0 %v3009_v58 }
 0x20d   : > { %2586 = vmatprep.mubr.bf16.mxu0 %v3035_v30 }
 0x213   : > { %2555 = vmatmul.mubr.bf16.gmra.mrb[52].mxu1 %v3054_v3 }
 0x214   : > { %2558 = vmatprep.mubr.bf16.mxu1 %v3078_v37  ;;  %2587 = vmatmul.mubr.bf16.gmra.mrb[68].mxu0 %v3059_v6 }
 0x215   : > { %2590 = vmatprep.mubr.bf16.mxu0 %v3083_v40 }
 0x21b   : > { %2559 = vmatmul.mubr.bf16.gmra.mrb[56].mxu1 %v3096_v13 }
 0x21c   : > { %2562 = vmatprep.mubr.bf16.mxu1 %v1032_v46  ;;  %2591 = vmatmul.mubr.bf16.gmra.mrb[72].mxu0 %v3098_v15 }
 0x21d   : > { %2594 = vmatprep.mubr.bf16.mxu0 %v1033_v47 }
 0x223   : > { %2563 = vmatmul.mubr.bf16.gmra.mrb[60].mxu1 %v1036_v20 }
 0x224   : > { %2595 = vmatmul.mubr.bf16.gmra.mrb[76].mxu0 %v1037_v60 }
 0x2a6   : > { %v2488_v62 = vpop.f32.mrb[32].mxu1 }
 0x2a7   : > { %v1152_v63 = vadd.f32 %v2488_v62, %v3131_v61  ;;  %v1143_v25 = vpop.f32.mrb[33].mxu1  ;;  %v2520_v27 = vpop.f32.mrb[48].mxu0 }
 0x2a8   : > { %v1144_v55 = vadd.f32 %v3131_v61, %v1143_v25  ;;  %v1416_v58 = vadd.f32 %v2520_v27, %v3131_v61  ;;  %v2489_v26 = vpop.f32.mrb[34].mxu1  ;;  %v1407_v30 = vpop.f32.mrb[49].mxu0 }
 0x2a9   : > { %v1208_v3 = vmax.f32 %v1152_v63, 0.0  ;;  %v1155_v6 = vadd.f32 %v2489_v26, %v3131_v61  ;;  %v1408_v37 = vadd.f32 %v3131_v61, %v1407_v30  ;;  %v1146_v40 = vpop.f32.mrb[35].mxu1  ;;  %v2521_v13 = vpop.f32.mrb[50].mxu0 }
 0x2aa   : > { %v1206_v15 = vmax.f32 %v1144_v55, 0.0  ;;  %v1472_v52 = vmax.f32 %v1416_v58, 0.0  ;;  %v1147_v22 = vadd.f32 %v3131_v61, %v1146_v40  ;;  %v1419_v23 = vadd.f32 %v2521_v13, %v3131_v61  ;;  %v1410_v24 = vpop.f32.mrb[51].mxu0 }
 0x2ab   : > { %v2317_v28 = vpack.c.bf16 %v1208_v3, %v1208_v3  ;;  %v1209_v29 = vmax.f32 %v1155_v6, 0.0  ;;  %v1470_v31 = vmax.f32 %v1408_v37, 0.0  ;;  %v1411_v32 = vadd.f32 %v3131_v61, %v1410_v24 }
 0x2ac   : > { %v2315_v33 = vpack.c.bf16 %v1206_v15, %v1206_v15  ;;  %v2333_v34 = vpack.c.bf16 %v1472_v52, %v1472_v52  ;;  %v1207_v35 = vmax.f32 %v1147_v22, 0.0  ;;  %v1473_v36 = vmax.f32 %v1419_v23, 0.0 }
 0x2ad   : > { %1288 = vst [vmem:[%s3142_s28 + $0x20] sm:$0xf] %v2317_v28  ;;  %v2318_v38 = vpack.c.bf16 %v1209_v29, %v1209_v29  ;;  %v2331_v39 = vpack.c.bf16 %v1470_v31, %v1470_v31  ;;  %v1471_v42 = vmax.f32 %v1411_v32, 0.0 }
 0x2ae   : > { %1286 = vst [vmem:[%s3142_s28] sm:$0xf] %v2315_v33  ;;  %1552 = vst [vmem:[%s3142_s28 + $0x24] sm:$0xf] %v2333_v34  ;;  %v2316_v43 = vpack.c.bf16 %v1207_v35, %v1207_v35  ;;  %v2334_v44 = vpack.c.bf16 %v1473_v36, %v1473_v36 }
 0x2af   : > { %1289 = vst [vmem:[%s3142_s28 + $0x30] sm:$0xf] %v2318_v38  ;;  %1550 = vst [vmem:[%s3142_s28 + $0x4] sm:$0xf] %v2331_v39  ;;  %v2332_v45 = vpack.c.bf16 %v1471_v42, %v1471_v42 }
 0x2b0   : > { %1287 = vst [vmem:[%s3142_s28 + $0x10] sm:$0xf] %v2316_v43  ;;  %1553 = vst [vmem:[%s3142_s28 + $0x34] sm:$0xf] %v2334_v44 }
 0x2b1   : > { %1551 = vst [vmem:[%s3142_s28 + $0x14] sm:$0xf] %v2332_v45 }
 0x2b6   : > { %v2492_v46 = vpop.f32.mrb[36].mxu1 }
 0x2b7   : > { %v1168_v41 = vadd.f32 %v2492_v46, %v3131_v61  ;;  %v1159_v47 = vpop.f32.mrb[37].mxu1  ;;  %v2524_v48 = vpop.f32.mrb[52].mxu0 }
 0x2b8   : > { %v1160_v49 = vadd.f32 %v3131_v61, %v1159_v47  ;;  %v1432_v50 = vadd.f32 %v2524_v48, %v3131_v61  ;;  %v2493_v53 = vpop.f32.mrb[38].mxu1  ;;  %v1423_v54 = vpop.f32.mrb[53].mxu0 }
 0x2b9   : > { %v1212_v56 = vmax.f32 %v1168_v41, 0.0  ;;  %v1171_v57 = vadd.f32 %v2493_v53, %v3131_v61  ;;  %v1424_v59 = vadd.f32 %v3131_v61, %v1423_v54  ;;  %v1162_v0 = vpop.f32.mrb[39].mxu1  ;;  %v2525_v1 = vpop.f32.mrb[54].mxu0 }
 0x2ba   : > { %v1210_v2 = vmax.f32 %v1160_v49, 0.0  ;;  %v1476_v4 = vmax.f32 %v1432_v50, 0.0  ;;  %v1163_v5 = vadd.f32 %v3131_v61, %v1162_v0  ;;  %v1435_v7 = vadd.f32 %v2525_v1, %v3131_v61  ;;  %v1426_v8 = vpop.f32.mrb[55].mxu0 }
 0x2bb   : > { %v2321_v9 = vpack.c.bf16 %v1212_v56, %v1212_v56  ;;  %v1213_v10 = vmax.f32 %v1171_v57, 0.0  ;;  %v1474_v11 = vmax.f32 %v1424_v59, 0.0  ;;  %v1427_v12 = vadd.f32 %v3131_v61, %v1426_v8 }
 0x2bc   : > { %v2319_v14 = vpack.c.bf16 %v1210_v2, %v1210_v2  ;;  %v2337_v16 = vpack.c.bf16 %v1476_v4, %v1476_v4  ;;  %v1211_v51 = vmax.f32 %v1163_v5, 0.0  ;;  %v1477_v17 = vmax.f32 %v1435_v7, 0.0 }
 0x2bd   : > { %1292 = vst [vmem:[%s3142_s28 + $0x60] sm:$0xf] %v2321_v9  ;;  %v2322_v18 = vpack.c.bf16 %v1213_v10, %v1213_v10  ;;  %v2335_v19 = vpack.c.bf16 %v1474_v11, %v1474_v11  ;;  %v1475_v20 = vmax.f32 %v1427_v12, 0.0 }
 0x2be   : > { %1290 = vst [vmem:[%s3142_s28 + $0x40] sm:$0xf] %v2319_v14  ;;  %1556 = vst [vmem:[%s3142_s28 + $0x64] sm:$0xf] %v2337_v16  ;;  %v2320_v21 = vpack.c.bf16 %v1211_v51, %v1211_v51  ;;  %v2338_v60 = vpack.c.bf16 %v1477_v17, %v1477_v17 }
 0x2bf   : > { %1293 = vst [vmem:[%s3142_s28 + $0x70] sm:$0xf] %v2322_v18  ;;  %1554 = vst [vmem:[%s3142_s28 + $0x44] sm:$0xf] %v2335_v19  ;;  %v2336_v62 = vpack.c.bf16 %v1475_v20, %v1475_v20 }
 0x2c0   : > { %1291 = vst [vmem:[%s3142_s28 + $0x50] sm:$0xf] %v2320_v21  ;;  %1557 = vst [vmem:[%s3142_s28 + $0x74] sm:$0xf] %v2338_v60 }
 0x2c1   : > { %1555 = vst [vmem:[%s3142_s28 + $0x54] sm:$0xf] %v2336_v62 }
 0x2c6   : > { %v2496_v63 = vpop.f32.mrb[40].mxu1 }
 0x2c7   : > { %v1184_v25 = vadd.f32 %v2496_v63, %v3131_v61  ;;  %v1175_v27 = vpop.f32.mrb[41].mxu1  ;;  %v2528_v55 = vpop.f32.mrb[56].mxu0 }
 0x2c8   : > { %v1176_v58 = vadd.f32 %v3131_v61, %v1175_v27  ;;  %v1448_v26 = vadd.f32 %v2528_v55, %v3131_v61  ;;  %v2497_v30 = vpop.f32.mrb[42].mxu1  ;;  %v1439_v3 = vpop.f32.mrb[57].mxu0 }
 0x2c9   : > { %v1216_v6 = vmax.f32 %v1184_v25, 0.0  ;;  %v1187_v37 = vadd.f32 %v2497_v30, %v3131_v61  ;;  %v1440_v40 = vadd.f32 %v3131_v61, %v1439_v3  ;;  %v1178_v13 = vpop.f32.mrb[43].mxu1  ;;  %v2529_v15 = vpop.f32.mrb[58].mxu0 }
 0x2ca   : > { %v1214_v52 = vmax.f32 %v1176_v58, 0.0  ;;  %v1480_v22 = vmax.f32 %v1448_v26, 0.0  ;;  %v1179_v23 = vadd.f32 %v3131_v61, %v1178_v13  ;;  %v1451_v24 = vadd.f32 %v2529_v15, %v3131_v61  ;;  %v1442_v28 = vpop.f32.mrb[59].mxu0 }
 0x2cb   : > { %v2325_v29 = vpack.c.bf16 %v1216_v6, %v1216_v6  ;;  %v1217_v31 = vmax.f32 %v1187_v37, 0.0  ;;  %v1478_v32 = vmax.f32 %v1440_v40, 0.0  ;;  %v1443_v33 = vadd.f32 %v3131_v61, %v1442_v28 }
 0x2cc   : > { %v2323_v34 = vpack.c.bf16 %v1214_v52, %v1214_v52  ;;  %v2341_v35 = vpack.c.bf16 %v1480_v22, %v1480_v22  ;;  %v1215_v36 = vmax.f32 %v1179_v23, 0.0  ;;  %v1481_v38 = vmax.f32 %v1451_v24, 0.0 }
 0x2cd   : > { %1296 = vst [vmem:[%s3142_s28 + $0xa0] sm:$0xf] %v2325_v29  ;;  %v2326_v39 = vpack.c.bf16 %v1217_v31, %v1217_v31  ;;  %v2339_v42 = vpack.c.bf16 %v1478_v32, %v1478_v32  ;;  %v1479_v43 = vmax.f32 %v1443_v33, 0.0 }
 0x2ce   : > { %1294 = vst [vmem:[%s3142_s28 + $0x80] sm:$0xf] %v2323_v34  ;;  %1560 = vst [vmem:[%s3142_s28 + $0xa4] sm:$0xf] %v2341_v35  ;;  %v2324_v44 = vpack.c.bf16 %v1215_v36, %v1215_v36  ;;  %v2342_v45 = vpack.c.bf16 %v1481_v38, %v1481_v38 }
 0x2cf   : > { %1297 = vst [vmem:[%s3142_s28 + $0xb0] sm:$0xf] %v2326_v39  ;;  %1558 = vst [vmem:[%s3142_s28 + $0x84] sm:$0xf] %v2339_v42  ;;  %v2340_v46 = vpack.c.bf16 %v1479_v43, %v1479_v43 }
 0x2d0   : > { %1295 = vst [vmem:[%s3142_s28 + $0x90] sm:$0xf] %v2324_v44  ;;  %1561 = vst [vmem:[%s3142_s28 + $0xb4] sm:$0xf] %v2342_v45 }
 0x2d1   : > { %1559 = vst [vmem:[%s3142_s28 + $0x94] sm:$0xf] %v2340_v46 }
 0x2d6   : > { %v2500_v41 = vpop.f32.mrb[44].mxu1 }
 0x2d7   : > { %v1200_v47 = vadd.f32 %v2500_v41, %v3131_v61  ;;  %v1191_v48 = vpop.f32.mrb[45].mxu1  ;;  %v2532_v49 = vpop.f32.mrb[60].mxu0 }
 0x2d8   : > { %v1192_v50 = vadd.f32 %v3131_v61, %v1191_v48  ;;  %v1464_v53 = vadd.f32 %v2532_v49, %v3131_v61  ;;  %v2501_v54 = vpop.f32.mrb[46].mxu1  ;;  %v1455_v56 = vpop.f32.mrb[61].mxu0 }
 0x2d9   : > { %v1220_v57 = vmax.f32 %v1200_v47, 0.0  ;;  %v1203_v59 = vadd.f32 %v2501_v54, %v3131_v61  ;;  %v1456_v0 = vadd.f32 %v3131_v61, %v1455_v56  ;;  %v1194_v1 = vpop.f32.mrb[47].mxu1  ;;  %v2533_v2 = vpop.f32.mrb[62].mxu0 }
 0x2da   : > { %v1218_v4 = vmax.f32 %v1192_v50, 0.0  ;;  %v1484_v5 = vmax.f32 %v1464_v53, 0.0  ;;  %v1195_v7 = vadd.f32 %v3131_v61, %v1194_v1  ;;  %v1467_v8 = vadd.f32 %v2533_v2, %v3131_v61  ;;  %v1458_v9 = vpop.f32.mrb[63].mxu0 }
 0x2db   : > { %v2329_v10 = vpack.c.bf16 %v1220_v57, %v1220_v57  ;;  %v1221_v11 = vmax.f32 %v1203_v59, 0.0  ;;  %v1482_v12 = vmax.f32 %v1456_v0, 0.0  ;;  %v1459_v14 = vadd.f32 %v3131_v61, %v1458_v9 }
 0x2dc   : > { %v2327_v16 = vpack.c.bf16 %v1218_v4, %v1218_v4  ;;  %v2345_v51 = vpack.c.bf16 %v1484_v5, %v1484_v5  ;;  %v1219_v17 = vmax.f32 %v1195_v7, 0.0  ;;  %v1485_v18 = vmax.f32 %v1467_v8, 0.0 }
 0x2dd   : > { %1300 = vst [vmem:[%s3142_s28 + $0xe0] sm:$0xf] %v2329_v10  ;;  %v2330_v19 = vpack.c.bf16 %v1221_v11, %v1221_v11  ;;  %v2343_v20 = vpack.c.bf16 %v1482_v12, %v1482_v12  ;;  %v1483_v21 = vmax.f32 %v1459_v14, 0.0 }
 0x2de   : > { %1298 = vst [vmem:[%s3142_s28 + $0xc0] sm:$0xf] %v2327_v16  ;;  %1564 = vst [vmem:[%s3142_s28 + $0xe4] sm:$0xf] %v2345_v51  ;;  %v2328_v60 = vpack.c.bf16 %v1219_v17, %v1219_v17  ;;  %v2346_v62 = vpack.c.bf16 %v1485_v18, %v1485_v18  ;;  %v2552_v63 = vpop.f32.mrb[48].mxu1 }
 0x2df   : > { %1301 = vst [vmem:[%s3142_s28 + $0xf0] sm:$0xf] %v2330_v19  ;;  %1562 = vst [vmem:[%s3142_s28 + $0xc4] sm:$0xf] %v2343_v20  ;;  %v2344_v25 = vpack.c.bf16 %v1483_v21, %v1483_v21  ;;  %v1680_v27 = vadd.f32 %v2552_v63, %v3131_v61  ;;  %v1671_v55 = vpop.f32.mrb[49].mxu1  ;;  %v2584_v58 = vpop.f32.mrb[64].mxu0 }
 0x2e0   : > { %1299 = vst [vmem:[%s3142_s28 + $0xd0] sm:$0xf] %v2328_v60  ;;  %1565 = vst [vmem:[%s3142_s28 + $0xf4] sm:$0xf] %v2346_v62  ;;  %v1672_v26 = vadd.f32 %v3131_v61, %v1671_v55  ;;  %v1944_v30 = vadd.f32 %v2584_v58, %v3131_v61  ;;  %v2553_v3 = vpop.f32.mrb[50].mxu1  ;;  %v1935_v6 = vpop.f32.mrb[65].mxu0 }
 0x2e1   : > { %1563 = vst [vmem:[%s3142_s28 + $0xd4] sm:$0xf] %v2344_v25  ;;  %v1736_v37 = vmax.f32 %v1680_v27, 0.0  ;;  %v1683_v40 = vadd.f32 %v2553_v3, %v3131_v61  ;;  %v1936_v13 = vadd.f32 %v3131_v61, %v1935_v6  ;;  %v1674_v15 = vpop.f32.mrb[51].mxu1  ;;  %v2585_v52 = vpop.f32.mrb[66].mxu0 }
 0x2e2   : > { %v1734_v22 = vmax.f32 %v1672_v26, 0.0  ;;  %v2000_v23 = vmax.f32 %v1944_v30, 0.0  ;;  %v1675_v24 = vadd.f32 %v3131_v61, %v1674_v15  ;;  %v1947_v28 = vadd.f32 %v2585_v52, %v3131_v61  ;;  %v1938_v29 = vpop.f32.mrb[67].mxu0 }
 0x2e3   : > { %v2349_v31 = vpack.c.bf16 %v1736_v37, %v1736_v37  ;;  %v1737_v32 = vmax.f32 %v1683_v40, 0.0  ;;  %v1998_v33 = vmax.f32 %v1936_v13, 0.0  ;;  %v1939_v34 = vadd.f32 %v3131_v61, %v1938_v29 }
 0x2e4   : > { %v2347_v35 = vpack.c.bf16 %v1734_v22, %v1734_v22  ;;  %v2365_v36 = vpack.c.bf16 %v2000_v23, %v2000_v23  ;;  %v1735_v38 = vmax.f32 %v1675_v24, 0.0  ;;  %v2001_v39 = vmax.f32 %v1947_v28, 0.0 }
 0x2e5   : > { %1816 = vst [vmem:[%s3142_s28 + $0x28] sm:$0xf] %v2349_v31  ;;  %v2350_v42 = vpack.c.bf16 %v1737_v32, %v1737_v32  ;;  %v2363_v43 = vpack.c.bf16 %v1998_v33, %v1998_v33  ;;  %v1999_v44 = vmax.f32 %v1939_v34, 0.0 }
 0x2e6   : > { %1814 = vst [vmem:[%s3142_s28 + $0x8] sm:$0xf] %v2347_v35  ;;  %2080 = vst [vmem:[%s3142_s28 + $0x2c] sm:$0xf] %v2365_v36  ;;  %v2348_v45 = vpack.c.bf16 %v1735_v38, %v1735_v38  ;;  %v2366_v46 = vpack.c.bf16 %v2001_v39, %v2001_v39  ;;  %v2556_v41 = vpop.f32.mrb[52].mxu1 }
 0x2e7   : > { %1817 = vst [vmem:[%s3142_s28 + $0x38] sm:$0xf] %v2350_v42  ;;  %2078 = vst [vmem:[%s3142_s28 + $0xc] sm:$0xf] %v2363_v43  ;;  %v2364_v47 = vpack.c.bf16 %v1999_v44, %v1999_v44  ;;  %v1696_v48 = vadd.f32 %v2556_v41, %v3131_v61  ;;  %v1687_v49 = vpop.f32.mrb[53].mxu1  ;;  %v2588_v50 = vpop.f32.mrb[68].mxu0 }
 0x2e8   : > { %1815 = vst [vmem:[%s3142_s28 + $0x18] sm:$0xf] %v2348_v45  ;;  %2081 = vst [vmem:[%s3142_s28 + $0x3c] sm:$0xf] %v2366_v46  ;;  %v1688_v53 = vadd.f32 %v3131_v61, %v1687_v49  ;;  %v1960_v54 = vadd.f32 %v2588_v50, %v3131_v61  ;;  %v2557_v56 = vpop.f32.mrb[54].mxu1  ;;  %v1951_v57 = vpop.f32.mrb[69].mxu0 }
 0x2e9   : > { %2079 = vst [vmem:[%s3142_s28 + $0x1c] sm:$0xf] %v2364_v47  ;;  %v1740_v59 = vmax.f32 %v1696_v48, 0.0  ;;  %v1699_v0 = vadd.f32 %v2557_v56, %v3131_v61  ;;  %v1952_v1 = vadd.f32 %v3131_v61, %v1951_v57  ;;  %v1690_v2 = vpop.f32.mrb[55].mxu1  ;;  %v2589_v4 = vpop.f32.mrb[70].mxu0 }
 0x2ea   : > { %v1738_v5 = vmax.f32 %v1688_v53, 0.0  ;;  %v2004_v7 = vmax.f32 %v1960_v54, 0.0  ;;  %v1691_v8 = vadd.f32 %v3131_v61, %v1690_v2  ;;  %v1963_v9 = vadd.f32 %v2589_v4, %v3131_v61  ;;  %v1954_v10 = vpop.f32.mrb[71].mxu0 }
 0x2eb   : > { %v2353_v11 = vpack.c.bf16 %v1740_v59, %v1740_v59  ;;  %v1741_v12 = vmax.f32 %v1699_v0, 0.0  ;;  %v2002_v14 = vmax.f32 %v1952_v1, 0.0  ;;  %v1955_v16 = vadd.f32 %v3131_v61, %v1954_v10 }
 0x2ec   : > { %v2351_v51 = vpack.c.bf16 %v1738_v5, %v1738_v5  ;;  %v2369_v17 = vpack.c.bf16 %v2004_v7, %v2004_v7  ;;  %v1739_v18 = vmax.f32 %v1691_v8, 0.0  ;;  %v2005_v19 = vmax.f32 %v1963_v9, 0.0 }
 0x2ed   : > { %1820 = vst [vmem:[%s3142_s28 + $0x68] sm:$0xf] %v2353_v11  ;;  %v2354_v20 = vpack.c.bf16 %v1741_v12, %v1741_v12  ;;  %v2367_v21 = vpack.c.bf16 %v2002_v14, %v2002_v14  ;;  %v2003_v60 = vmax.f32 %v1955_v16, 0.0 }
 0x2ee   : > { %1818 = vst [vmem:[%s3142_s28 + $0x48] sm:$0xf] %v2351_v51  ;;  %2084 = vst [vmem:[%s3142_s28 + $0x6c] sm:$0xf] %v2369_v17  ;;  %v2352_v62 = vpack.c.bf16 %v1739_v18, %v1739_v18  ;;  %v2370_v63 = vpack.c.bf16 %v2005_v19, %v2005_v19  ;;  %v2560_v25 = vpop.f32.mrb[56].mxu1 }
 0x2ef   : > { %1821 = vst [vmem:[%s3142_s28 + $0x78] sm:$0xf] %v2354_v20  ;;  %2082 = vst [vmem:[%s3142_s28 + $0x4c] sm:$0xf] %v2367_v21  ;;  %v2368_v27 = vpack.c.bf16 %v2003_v60, %v2003_v60  ;;  %v1712_v55 = vadd.f32 %v2560_v25, %v3131_v61  ;;  %v1703_v58 = vpop.f32.mrb[57].mxu1  ;;  %v2592_v26 = vpop.f32.mrb[72].mxu0 }
 0x2f0   : > { %1819 = vst [vmem:[%s3142_s28 + $0x58] sm:$0xf] %v2352_v62  ;;  %2085 = vst [vmem:[%s3142_s28 + $0x7c] sm:$0xf] %v2370_v63  ;;  %v1704_v30 = vadd.f32 %v3131_v61, %v1703_v58  ;;  %v1976_v3 = vadd.f32 %v2592_v26, %v3131_v61  ;;  %v2561_v6 = vpop.f32.mrb[58].mxu1  ;;  %v1967_v37 = vpop.f32.mrb[73].mxu0 }
 0x2f1   : > { %2083 = vst [vmem:[%s3142_s28 + $0x5c] sm:$0xf] %v2368_v27  ;;  %v1744_v40 = vmax.f32 %v1712_v55, 0.0  ;;  %v1715_v13 = vadd.f32 %v2561_v6, %v3131_v61  ;;  %v1968_v15 = vadd.f32 %v3131_v61, %v1967_v37  ;;  %v1706_v52 = vpop.f32.mrb[59].mxu1  ;;  %v2593_v22 = vpop.f32.mrb[74].mxu0 }
 0x2f2   : > { %v1742_v23 = vmax.f32 %v1704_v30, 0.0  ;;  %v2008_v24 = vmax.f32 %v1976_v3, 0.0  ;;  %v1707_v28 = vadd.f32 %v3131_v61, %v1706_v52  ;;  %v1979_v29 = vadd.f32 %v2593_v22, %v3131_v61  ;;  %v1970_v31 = vpop.f32.mrb[75].mxu0 }
 0x2f3   : > { %v2357_v32 = vpack.c.bf16 %v1744_v40, %v1744_v40  ;;  %v1745_v33 = vmax.f32 %v1715_v13, 0.0  ;;  %v2006_v34 = vmax.f32 %v1968_v15, 0.0  ;;  %v1971_v35 = vadd.f32 %v3131_v61, %v1970_v31 }
 0x2f4   : > { %v2355_v36 = vpack.c.bf16 %v1742_v23, %v1742_v23  ;;  %v2373_v38 = vpack.c.bf16 %v2008_v24, %v2008_v24  ;;  %v1743_v39 = vmax.f32 %v1707_v28, 0.0  ;;  %v2009_v42 = vmax.f32 %v1979_v29, 0.0 }
 0x2f5   : > { %1824 = vst [vmem:[%s3142_s28 + $0xa8] sm:$0xf] %v2357_v32  ;;  %v2358_v43 = vpack.c.bf16 %v1745_v33, %v1745_v33  ;;  %v2371_v44 = vpack.c.bf16 %v2006_v34, %v2006_v34  ;;  %v2007_v45 = vmax.f32 %v1971_v35, 0.0 }
 0x2f6   : > { %1822 = vst [vmem:[%s3142_s28 + $0x88] sm:$0xf] %v2355_v36  ;;  %2088 = vst [vmem:[%s3142_s28 + $0xac] sm:$0xf] %v2373_v38  ;;  %v2356_v46 = vpack.c.bf16 %v1743_v39, %v1743_v39  ;;  %v2374_v41 = vpack.c.bf16 %v2009_v42, %v2009_v42  ;;  %v2564_v47 = vpop.f32.mrb[60].mxu1 }
 0x2f7   : > { %1825 = vst [vmem:[%s3142_s28 + $0xb8] sm:$0xf] %v2358_v43  ;;  %2086 = vst [vmem:[%s3142_s28 + $0x8c] sm:$0xf] %v2371_v44  ;;  %v2372_v48 = vpack.c.bf16 %v2007_v45, %v2007_v45  ;;  %v1728_v49 = vadd.f32 %v2564_v47, %v3131_v61  ;;  %v1719_v50 = vpop.f32.mrb[61].mxu1  ;;  %v2596_v53 = vpop.f32.mrb[76].mxu0 }
 0x2f8   : > { %1823 = vst [vmem:[%s3142_s28 + $0x98] sm:$0xf] %v2356_v46  ;;  %2089 = vst [vmem:[%s3142_s28 + $0xbc] sm:$0xf] %v2374_v41  ;;  %v1720_v54 = vadd.f32 %v3131_v61, %v1719_v50  ;;  %v1992_v56 = vadd.f32 %v2596_v53, %v3131_v61  ;;  %v2565_v57 = vpop.f32.mrb[62].mxu1  ;;  %v1983_v59 = vpop.f32.mrb[77].mxu0 }
 0x2f9   : > { %2087 = vst [vmem:[%s3142_s28 + $0x9c] sm:$0xf] %v2372_v48  ;;  %v1748_v0 = vmax.f32 %v1728_v49, 0.0  ;;  %v1731_v1 = vadd.f32 %v2565_v57, %v3131_v61  ;;  %v1984_v2 = vadd.f32 %v3131_v61, %v1983_v59  ;;  %v1722_v4 = vpop.f32.mrb[63].mxu1  ;;  %v2597_v5 = vpop.f32.mrb[78].mxu0 }
 0x2fa   : > { %v1746_v7 = vmax.f32 %v1720_v54, 0.0  ;;  %v2012_v8 = vmax.f32 %v1992_v56, 0.0  ;;  %v1723_v9 = vadd.f32 %v3131_v61, %v1722_v4  ;;  %v1995_v10 = vadd.f32 %v2597_v5, %v3131_v61  ;;  %v1986_v11 = vpop.f32.mrb[79].mxu0 }
 0x2fb   : > { %v2361_v12 = vpack.c.bf16 %v1748_v0, %v1748_v0  ;;  %v1749_v14 = vmax.f32 %v1731_v1, 0.0  ;;  %v2010_v16 = vmax.f32 %v1984_v2, 0.0  ;;  %v1987_v51 = vadd.f32 %v3131_v61, %v1986_v11 }
 0x2fc   : > { %v2359_v17 = vpack.c.bf16 %v1746_v7, %v1746_v7  ;;  %v2377_v18 = vpack.c.bf16 %v2012_v8, %v2012_v8  ;;  %v1747_v19 = vmax.f32 %v1723_v9, 0.0  ;;  %v2013_v20 = vmax.f32 %v1995_v10, 0.0 }
 0x2fd   : > { %1828 = vst [vmem:[%s3142_s28 + $0xe8] sm:$0xf] %v2361_v12  ;;  %v2362_v21 = vpack.c.bf16 %v1749_v14, %v1749_v14  ;;  %v2375_v60 = vpack.c.bf16 %v2010_v16, %v2010_v16  ;;  %v2011_v62 = vmax.f32 %v1987_v51, 0.0 }
 0x2fe   : > { %1826 = vst [vmem:[%s3142_s28 + $0xc8] sm:$0xf] %v2359_v17  ;;  %2092 = vst [vmem:[%s3142_s28 + $0xec] sm:$0xf] %v2377_v18  ;;  %v2360_v63 = vpack.c.bf16 %v1747_v19, %v1747_v19  ;;  %v2378_v25 = vpack.c.bf16 %v2013_v20, %v2013_v20 }
 0x2ff   : > { %1829 = vst [vmem:[%s3142_s28 + $0xf8] sm:$0xf] %v2362_v21  ;;  %2090 = vst [vmem:[%s3142_s28 + $0xcc] sm:$0xf] %v2375_v60  ;;  %v2376_v27 = vpack.c.bf16 %v2011_v62, %v2011_v62 }
 0x300   : > { %1827 = vst [vmem:[%s3142_s28 + $0xd8] sm:$0xf] %v2360_v63  ;;  %2093 = vst [vmem:[%s3142_s28 + $0xfc] sm:$0xf] %v2378_v25 }
 0x301   : > { %2091 = vst [vmem:[%s3142_s28 + $0xdc] sm:$0xf] %v2376_v27 }
 0x302 PF: > { %s17_s24 = sadd.s32 1, %s2702_s24  }
 0x303   : > { %p14_p4 = scmp.ge.s32.totalorder %s17_s24, 6  }
 0x305   :  { %16 = sbr.rel (!%p14_p4) target bundleno = 1 (0x1), region = 78 }

</bundles_post_ra>
